<compile_context>
chip_gen: v6e
topology: v6e:2x2x1
jax: 0.10.0
libtpu: 0.0.40
codegen_flags: <defaults>
</compile_context>

<pallas_src>
import functools

import jax
import jax.numpy as jnp
from jax import lax
from jax.experimental import pallas as pl
from jax.experimental.pallas import tpu as pltpu


def _dwsep_kernel(x_top_ref, x_c_ref, x_bot_ref, dw_w_ref, dw_b_ref,
                  pw_w_ref, pw_b_ref, o_ref, *, TH, W, C, O, use_mxu, mxu_dtype):
    # x_top_ref: (1, 1, W, C)   row h0-1 (clamped; zeroed when tile is at the top edge)
    # x_c_ref:   (1, TH, W, C)  rows h0 .. h0+TH-1
    # x_bot_ref: (1, 1, W, C)   row h0+TH (clamped; zeroed when tile is at the bottom edge)
    # dw_w_ref:  (9, C)         depthwise 3x3 weights, row = 3*kh + kw
    # dw_b_ref:  (1, C)         depthwise bias
    # pw_w_ref:  (C, O)         pointwise 1x1 weights
    # pw_b_ref:  (1, O)         pointwise bias
    # o_ref:     (1, TH, W, O)
    i = pl.program_id(1)
    top_scale = jnp.where(i == 0, 0.0, 1.0).astype(jnp.float32)
    bot_scale = jnp.where(i == pl.num_programs(1) - 1, 0.0, 1.0).astype(jnp.float32)

    x_c = x_c_ref[0].astype(jnp.float32)                       # (TH, W, C)
    x_t = x_top_ref[0, 0].astype(jnp.float32) * top_scale      # (W, C)
    x_b = x_bot_ref[0, 0].astype(jnp.float32) * bot_scale      # (W, C)

    # Rows h0-1 .. h0+TH (zero outside the image) -> (TH+2, W, C).
    xs = jnp.concatenate([x_t[None], x_c, x_b[None]], axis=0)

    # Width-shifted copies for the kw = 0 / 2 taps (pad=1 along W), built ONCE per
    # tile instead of 9 unaligned sublane slices.
    zcol = jnp.zeros((TH + 2, 1, C), jnp.float32)
    xl = jnp.concatenate([zcol, xs[:, :W - 1, :]], axis=1)     # value at column w-1
    xr = jnp.concatenate([xs[:, 1:, :], zcol], axis=1)         # value at column w+1

    dw_w = dw_w_ref[...].astype(jnp.float32)                   # (9, C)
    dw_b = dw_b_ref[...].astype(jnp.float32).reshape(1, 1, C)

    # Depthwise 3x3 on the VPU: 9 taps, f32 accumulate, static unrolled loop
    # (weights read once per tap, nothing re-broadcast inside a dynamic loop).
    acc = jnp.zeros((TH, W, C), jnp.float32) + dw_b
    for kh in range(3):
        w0 = dw_w[3 * kh + 0].reshape(1, 1, C)
        w1 = dw_w[3 * kh + 1].reshape(1, 1, C)
        w2 = dw_w[3 * kh + 2].reshape(1, 1, C)
        acc = acc + xl[kh:kh + TH] * w0
        acc = acc + xs[kh:kh + TH] * w1
        acc = acc + xr[kh:kh + TH] * w2

    # Pointwise 1x1.
    pw_b = pw_b_ref[...].astype(jnp.float32).reshape(1, 1, O)
    if use_mxu:
        y = jnp.dot(acc.reshape(TH * W, C).astype(mxu_dtype),
                    pw_w_ref[...].astype(mxu_dtype),
                    preferred_element_type=jnp.float32)
        y = y.reshape(TH, W, O) + pw_b
    else:
        # Tiny C/O: MXU push/pop latency beats the work; do it on the VPU instead.
        pw_w = pw_w_ref[...].astype(jnp.float32)               # (C, O)
        y = jnp.zeros((TH, W, O), jnp.float32) + pw_b
        for c in range(C):
            y = y + acc[:, :, c:c + 1] * pw_w[c].reshape(1, 1, O)

    o_ref[0] = y.astype(o_ref.dtype)


def _auto_tile_h(H, W, C, O, itemsize):
    # Budget the double-buffered DMA tiles plus in-kernel f32 temporaries at ~8 MiB
    # so we never fight the scoped-VMEM limit on v5e/v6e/v7x.
    budget = 8 * 1024 * 1024
    per_row = 2 * (W * C + W * O) * itemsize + (5 * W * C + 2 * W * O) * 4
    th = max(1, min(H, budget // max(per_row, 1)))
    while H % th:
        th -= 1
    return int(th)


def depthwise_separable_conv_nhwc(x_nhwc, dw_w, dw_b, pw_w, pw_b,
                                  *, tile_h=None, out_dtype=None):
    """Fast path: NHWC in / NHWC out (no layout transposes, no wrapper padding).

    x_nhwc: (N, H, W, C) f32 or bf16.
    dw_w: (C, 1, 3, 3), dw_b: (C,), pw_w: (O, C, 1, 1), pw_b: (O,)  (torch layouts).
    """
    N, H, W, C = x_nhwc.shape
    O = pw_w.shape[0]
    storage_dt = x_nhwc.dtype
    if out_dtype is None:
        out_dtype = storage_dt

    if tile_h is None:
        tile_h = _auto_tile_h(H, W, C, O, jnp.dtype(storage_dt).itemsize)
    tile_h = int(min(max(tile_h, 1), H))
    while H % tile_h:                    # keep the grid exact
        tile_h -= 1

    # Weight / bias repacking (tiny tensors; kept in f32 for the accumulate).
    dw_w_k = jnp.transpose(dw_w[:, 0].reshape(C, 9), (1, 0)).astype(jnp.float32)   # (9, C)
    dw_b_k = dw_b.reshape(1, C).astype(jnp.float32)                                # (1, C)
    pw_w_k = jnp.transpose(pw_w[:, :, 0, 0], (1, 0)).astype(jnp.float32)           # (C, O)
    pw_b_k = pw_b.reshape(1, O).astype(jnp.float32)                                # (1, O)

    use_mxu = C >= 16
    mxu_dtype = jnp.bfloat16 if storage_dt == jnp.bfloat16 else jnp.float32

    kernel = functools.partial(_dwsep_kernel, TH=tile_h, W=W, C=C, O=O,
                               use_mxu=use_mxu, mxu_dtype=mxu_dtype)

    th = tile_h
    out_nhwc = pl.pallas_call(
        kernel,
        out_shape=jax.ShapeDtypeStruct((N, H, W, O), out_dtype),
        grid_spec=pltpu.PrefetchScalarGridSpec(
            num_scalar_prefetch=0,
            grid=(N, H // th),
            in_specs=[
                # top halo row (block size 1 along H => block index == row index, clamped)
                pl.BlockSpec((1, 1, W, C),
                             lambda n, i: (n, jnp.maximum(i * th - 1, 0), 0, 0)),
                # center rows of this H-tile
                pl.BlockSpec((1, th, W, C), lambda n, i: (n, i, 0, 0)),
                # bottom halo row (clamped)
                pl.BlockSpec((1, 1, W, C),
                             lambda n, i: (n, jnp.minimum((i + 1) * th, H - 1), 0, 0)),
                # weights / biases: constant block index => DMA'd once, stay resident
                pl.BlockSpec((9, C), lambda n, i: (0, 0)),
                pl.BlockSpec((1, C), lambda n, i: (0, 0)),
                pl.BlockSpec((C, O), lambda n, i: (0, 0)),
                pl.BlockSpec((1, O), lambda n, i: (0, 0)),
            ],
            out_specs=pl.BlockSpec((1, th, W, O), lambda n, i: (n, i, 0, 0)),
        ),
        compiler_params=pltpu.CompilerParams(
            dimension_semantics=("parallel", "parallel"),
            vmem_limit_bytes=32 * 1024 * 1024),
    )(x_nhwc, x_nhwc, x_nhwc, dw_w_k, dw_b_k, pw_w_k, pw_b_k)

    return out_nhwc


def depthwise_separable_conv(x_nchw, dw_w, dw_b, pw_w, pw_b, **kwargs):
    """PyTorch-layout adapter (NCHW in / NCHW out).

    Prefer `depthwise_separable_conv_nhwc` and keep the network NHWC end-to-end:
    the two transposes here are extra HBM passes and should only appear once at the
    network boundary.
    """
    x_nhwc = jnp.transpose(x_nchw, (0, 2, 3, 1))
    out = depthwise_separable_conv_nhwc(x_nhwc, dw_w, dw_b, pw_w, pw_b, **kwargs)
    return jnp.transpose(out, (0, 3, 1, 2))


def _reference(x_nchw, dw_w, dw_b, pw_w, pw_b):
    # Pure-JAX reference (NCHW, matches torch Conv2d semantics).
    C = x_nchw.shape[1]
    dn = lax.conv_dimension_numbers(x_nchw.shape, dw_w.shape, ("NCHW", "OIHW", "NCHW"))
    out = lax.conv_general_dilated(
        x_nchw, dw_w, window_strides=(1, 1), padding=((1, 1), (1, 1)),
        dimension_numbers=dn, feature_group_count=C)
    out = out + dw_b.reshape(1, C, 1, 1)
    dn2 = lax.conv_dimension_numbers(out.shape, pw_w.shape, ("NCHW", "OIHW", "NCHW"))
    out = lax.conv_general_dilated(
        out, pw_w, window_strides=(1, 1), padding=((0, 0), (0, 0)),
        dimension_numbers=dn2)
    out = out + pw_b.reshape(1, -1, 1, 1)
    return out


def _make_params(key, C_in, C_out):
    k_dw, k_dwb, k_pw, k_pwb = jax.random.split(key, 4)
    dw_w = jax.random.normal(k_dw, (C_in, 1, 3, 3), dtype=jnp.float32) * 0.1
    dw_b = jax.random.normal(k_dwb, (C_in,), dtype=jnp.float32) * 0.1
    pw_w = jax.random.normal(k_pw, (C_out, C_in, 1, 1), dtype=jnp.float32) * 0.1
    pw_b = jax.random.normal(k_pwb, (C_out,), dtype=jnp.float32) * 0.1
    return dw_w, dw_b, pw_w, pw_b


if __name__ == "__main__":
    key = jax.random.PRNGKey(0)
    k_x, k_p, k_x2, k_p2 = jax.random.split(key, 4)

    # ---- config matching the PyTorch module spec (tiny channels -> VPU pointwise path)
    N, C_in, C_out, H, W = 2, 4, 8, 16, 16
    x = jax.random.normal(k_x, (N, C_in, H, W), dtype=jnp.float32)
    dw_w, dw_b, pw_w, pw_b = _make_params(k_p, C_in, C_out)

    ref = jax.block_until_ready(_reference(x, dw_w, dw_b, pw_w, pw_b))
    ref_nhwc = jnp.transpose(ref, (0, 2, 3, 1))
    x_nhwc = jnp.transpose(x, (0, 2, 3, 1))

    # 1) NHWC fast path, H-tiled (tile_h=8 -> 2x2 grid, exercises halo zeroing)
    out1 = jax.block_until_ready(
        depthwise_separable_conv_nhwc(x_nhwc, dw_w, dw_b, pw_w, pw_b, tile_h=8))
    assert out1.shape == (N, H, W, C_out), out1.shape
    assert jnp.allclose(out1, ref_nhwc, atol=1e-4, rtol=1e-4), \
        float(jnp.max(jnp.abs(out1 - ref_nhwc)))

    # 2) NCHW adapter (PyTorch parity), auto tile size (single H-tile: both halos zeroed)
    out2 = jax.block_until_ready(
        depthwise_separable_conv(x, dw_w, dw_b, pw_w, pw_b))
    assert out2.shape == (N, C_out, H, W), out2.shape
    assert jnp.allclose(out2, ref, atol=1e-4, rtol=1e-4), \
        float(jnp.max(jnp.abs(out2 - ref)))

    # 3) bf16 activations/output (halved HBM traffic), f32 accumulation in-kernel
    out3 = jax.block_until_ready(
        depthwise_separable_conv_nhwc(x_nhwc.astype(jnp.bfloat16),
                                      dw_w, dw_b, pw_w, pw_b, tile_h=8))
    assert jnp.allclose(out3.astype(jnp.float32), ref_nhwc, atol=5e-2, rtol=5e-2), \
        float(jnp.max(jnp.abs(out3.astype(jnp.float32) - ref_nhwc)))

    # 4) larger channel count -> MXU pointwise path (also exercises halos)
    N2, C2, O2, H2, W2 = 1, 32, 64, 16, 8
    x2 = jax.random.normal(k_x2, (N2, C2, H2, W2), dtype=jnp.float32)
    p2 = _make_params(k_p2, C2, O2)
    ref2 = jax.block_until_ready(_reference(x2, *p2))
    ref2_nhwc = jnp.transpose(ref2, (0, 2, 3, 1))
    out4 = jax.block_until_ready(
        depthwise_separable_conv_nhwc(jnp.transpose(x2, (0, 2, 3, 1)), *p2, tile_h=8))
    assert jnp.allclose(out4, ref2_nhwc, atol=1e-2, rtol=1e-2), \
        float(jnp.max(jnp.abs(out4 - ref2_nhwc)))

    print("KERNEL_OK")
</pallas_src>

<mosaic_0001>
module attributes {stable_mosaic.version = 11 : i64} {
  func.func @_dwsep_kernel(%arg0: i32, %arg1: i32, %arg2: memref<1x1x16x4xf32, #tpu.memory_space<vmem>>, %arg3: memref<1x8x16x4xf32, #tpu.memory_space<vmem>>, %arg4: memref<1x1x16x4xf32, #tpu.memory_space<vmem>>, %arg5: memref<9x4xf32, #tpu.memory_space<vmem>>, %arg6: memref<1x4xf32, #tpu.memory_space<vmem>>, %arg7: memref<4x8xf32, #tpu.memory_space<vmem>>, %arg8: memref<1x8xf32, #tpu.memory_space<vmem>>, %arg9: memref<1x8x16x8xf32, #tpu.memory_space<vmem>>) attributes {dimension_semantics = [#tpu.dimension_semantics<parallel>, #tpu.dimension_semantics<parallel>], iteration_bounds = array<i64: 2, 2>, scalar_prefetch = 0 : i64, scratch_operands = 0 : i64, tpu.core_type = #tpu.core_type<tc>, window_params = [{transform_indices = @transform_0, window_bounds = array<i64: 1, 1, 16, 4>}, {transform_indices = @transform_1, window_bounds = array<i64: 1, 8, 16, 4>}, {transform_indices = @transform_2, window_bounds = array<i64: 1, 1, 16, 4>}, {pipeline_mode = #tpu.pipeline_mode<synchronous>, transform_indices = @transform_3, window_bounds = array<i64: 9, 4>}, {pipeline_mode = #tpu.pipeline_mode<synchronous>, transform_indices = @transform_4, window_bounds = array<i64: 1, 4>}, {pipeline_mode = #tpu.pipeline_mode<synchronous>, transform_indices = @transform_5, window_bounds = array<i64: 4, 8>}, {pipeline_mode = #tpu.pipeline_mode<synchronous>, transform_indices = @transform_6, window_bounds = array<i64: 1, 8>}, {transform_indices = @transform_7, window_bounds = array<i64: 1, 8, 16, 8>}]} {
    %c0_i32 = arith.constant 0 : i32
    %0 = arith.cmpi eq, %arg1, %c0_i32 : i32
    %cst = arith.constant 0.000000e+00 : f32
    %cst_0 = arith.constant 1.000000e+00 : f32
    %1 = arith.select %0, %cst, %cst_0 : f32
    %c1_i32 = arith.constant 1 : i32
    %2 = arith.cmpi eq, %arg1, %c1_i32 : i32
    %cst_1 = arith.constant 0.000000e+00 : f32
    %cst_2 = arith.constant 1.000000e+00 : f32
    %3 = arith.select %2, %cst_1, %cst_2 : f32
    %c0 = arith.constant 0 : index
    %c0_3 = arith.constant 0 : index
    %c0_4 = arith.constant 0 : index
    %c0_5 = arith.constant 0 : index
    %4 = vector.load %arg3[%c0, %c0_3, %c0_4, %c0_5] : memref<1x8x16x4xf32, #tpu.memory_space<vmem>>, vector<1x8x16x4xf32>
    %5 = vector.shape_cast %4 : vector<1x8x16x4xf32> to vector<8x16x4xf32>
    %c0_6 = arith.constant 0 : index
    %c0_7 = arith.constant 0 : index
    %c0_8 = arith.constant 0 : index
    %c0_9 = arith.constant 0 : index
    %6 = vector.load %arg2[%c0_6, %c0_7, %c0_8, %c0_9] : memref<1x1x16x4xf32, #tpu.memory_space<vmem>>, vector<1x1x16x4xf32>
    %7 = vector.shape_cast %6 : vector<1x1x16x4xf32> to vector<16x4xf32>
    %8 = vector.broadcast %1 : f32 to vector<16x4xf32>
    %9 = arith.mulf %7, %8 : vector<16x4xf32>
    %c0_10 = arith.constant 0 : index
    %c0_11 = arith.constant 0 : index
    %c0_12 = arith.constant 0 : index
    %c0_13 = arith.constant 0 : index
    %10 = vector.load %arg4[%c0_10, %c0_11, %c0_12, %c0_13] : memref<1x1x16x4xf32, #tpu.memory_space<vmem>>, vector<1x1x16x4xf32>
    %11 = vector.shape_cast %10 : vector<1x1x16x4xf32> to vector<16x4xf32>
    %12 = vector.broadcast %3 : f32 to vector<16x4xf32>
    %13 = arith.mulf %11, %12 : vector<16x4xf32>
    %14 = vector.shape_cast %9 : vector<16x4xf32> to vector<1x16x4xf32>
    %15 = vector.shape_cast %13 : vector<16x4xf32> to vector<1x16x4xf32>
    %16 = tpu.concatenate %14, %5, %15 in 0 : vector<1x16x4xf32>, vector<8x16x4xf32>, vector<1x16x4xf32> -> vector<10x16x4xf32>
    %cst_14 = arith.constant 0.000000e+00 : f32
    %17 = vector.broadcast %cst_14 : f32 to vector<10x1x4xf32>
    %18 = vector.extract_strided_slice %16 {offsets = [0, 0, 0], sizes = [10, 15, 4], strides = [1, 1, 1]} : vector<10x16x4xf32> to vector<10x15x4xf32>
    %19 = tpu.concatenate %17, %18 in 1 : vector<10x1x4xf32>, vector<10x15x4xf32> -> vector<10x16x4xf32>
    %20 = vector.extract_strided_slice %16 {offsets = [0, 1, 0], sizes = [10, 15, 4], strides = [1, 1, 1]} : vector<10x16x4xf32> to vector<10x15x4xf32>
    %21 = tpu.concatenate %20, %17 in 1 : vector<10x15x4xf32>, vector<10x1x4xf32> -> vector<10x16x4xf32>
    %c0_15 = arith.constant 0 : index
    %c0_16 = arith.constant 0 : index
    %22 = vector.load %arg5[%c0_15, %c0_16] : memref<9x4xf32, #tpu.memory_space<vmem>>, vector<9x4xf32>
    %c0_17 = arith.constant 0 : index
    %c0_18 = arith.constant 0 : index
    %23 = vector.load %arg6[%c0_17, %c0_18] : memref<1x4xf32, #tpu.memory_space<vmem>>, vector<1x4xf32>
    %24 = vector.shape_cast %23 : vector<1x4xf32> to vector<1x1x4xf32>
    %cst_19 = arith.constant 0.000000e+00 : f32
    %25 = vector.broadcast %cst_19 : f32 to vector<8x16x4xf32>
    %26 = vector.broadcast %24 : vector<1x1x4xf32> to vector<8x16x4xf32>
    %27 = arith.addf %25, %26 : vector<8x16x4xf32>
    %28 = vector.extract_strided_slice %22 {offsets = [0, 0], sizes = [1, 4], strides = [1, 1]} : vector<9x4xf32> to vector<1x4xf32>
    %29 = vector.shape_cast %28 : vector<1x4xf32> to vector<4xf32>
    %30 = vector.shape_cast %29 : vector<4xf32> to vector<1x1x4xf32>
    %31 = vector.extract_strided_slice %22 {offsets = [1, 0], sizes = [1, 4], strides = [1, 1]} : vector<9x4xf32> to vector<1x4xf32>
    %32 = vector.shape_cast %31 : vector<1x4xf32> to vector<4xf32>
    %33 = vector.shape_cast %32 : vector<4xf32> to vector<1x1x4xf32>
    %34 = vector.extract_strided_slice %22 {offsets = [2, 0], sizes = [1, 4], strides = [1, 1]} : vector<9x4xf32> to vector<1x4xf32>
    %35 = vector.shape_cast %34 : vector<1x4xf32> to vector<4xf32>
    %36 = vector.shape_cast %35 : vector<4xf32> to vector<1x1x4xf32>
    %37 = vector.extract_strided_slice %19 {offsets = [0, 0, 0], sizes = [8, 16, 4], strides = [1, 1, 1]} : vector<10x16x4xf32> to vector<8x16x4xf32>
    %38 = vector.broadcast %30 : vector<1x1x4xf32> to vector<8x16x4xf32>
    %39 = arith.mulf %37, %38 : vector<8x16x4xf32>
    %40 = arith.addf %27, %39 : vector<8x16x4xf32>
    %41 = vector.extract_strided_slice %16 {offsets = [0, 0, 0], sizes = [8, 16, 4], strides = [1, 1, 1]} : vector<10x16x4xf32> to vector<8x16x4xf32>
    %42 = vector.broadcast %33 : vector<1x1x4xf32> to vector<8x16x4xf32>
    %43 = arith.mulf %41, %42 : vector<8x16x4xf32>
    %44 = arith.addf %40, %43 : vector<8x16x4xf32>
    %45 = vector.extract_strided_slice %21 {offsets = [0, 0, 0], sizes = [8, 16, 4], strides = [1, 1, 1]} : vector<10x16x4xf32> to vector<8x16x4xf32>
    %46 = vector.broadcast %36 : vector<1x1x4xf32> to vector<8x16x4xf32>
    %47 = arith.mulf %45, %46 : vector<8x16x4xf32>
    %48 = arith.addf %44, %47 : vector<8x16x4xf32>
    %49 = vector.extract_strided_slice %22 {offsets = [3, 0], sizes = [1, 4], strides = [1, 1]} : vector<9x4xf32> to vector<1x4xf32>
    %50 = vector.shape_cast %49 : vector<1x4xf32> to vector<4xf32>
    %51 = vector.shape_cast %50 : vector<4xf32> to vector<1x1x4xf32>
    %52 = vector.extract_strided_slice %22 {offsets = [4, 0], sizes = [1, 4], strides = [1, 1]} : vector<9x4xf32> to vector<1x4xf32>
    %53 = vector.shape_cast %52 : vector<1x4xf32> to vector<4xf32>
    %54 = vector.shape_cast %53 : vector<4xf32> to vector<1x1x4xf32>
    %55 = vector.extract_strided_slice %22 {offsets = [5, 0], sizes = [1, 4], strides = [1, 1]} : vector<9x4xf32> to vector<1x4xf32>
    %56 = vector.shape_cast %55 : vector<1x4xf32> to vector<4xf32>
    %57 = vector.shape_cast %56 : vector<4xf32> to vector<1x1x4xf32>
    %58 = vector.extract_strided_slice %19 {offsets = [1, 0, 0], sizes = [8, 16, 4], strides = [1, 1, 1]} : vector<10x16x4xf32> to vector<8x16x4xf32>
    %59 = vector.broadcast %51 : vector<1x1x4xf32> to vector<8x16x4xf32>
    %60 = arith.mulf %58, %59 : vector<8x16x4xf32>
    %61 = arith.addf %48, %60 : vector<8x16x4xf32>
    %62 = vector.extract_strided_slice %16 {offsets = [1, 0, 0], sizes = [8, 16, 4], strides = [1, 1, 1]} : vector<10x16x4xf32> to vector<8x16x4xf32>
    %63 = vector.broadcast %54 : vector<1x1x4xf32> to vector<8x16x4xf32>
    %64 = arith.mulf %62, %63 : vector<8x16x4xf32>
    %65 = arith.addf %61, %64 : vector<8x16x4xf32>
    %66 = vector.extract_strided_slice %21 {offsets = [1, 0, 0], sizes = [8, 16, 4], strides = [1, 1, 1]} : vector<10x16x4xf32> to vector<8x16x4xf32>
    %67 = vector.broadcast %57 : vector<1x1x4xf32> to vector<8x16x4xf32>
    %68 = arith.mulf %66, %67 : vector<8x16x4xf32>
    %69 = arith.addf %65, %68 : vector<8x16x4xf32>
    %70 = vector.extract_strided_slice %22 {offsets = [6, 0], sizes = [1, 4], strides = [1, 1]} : vector<9x4xf32> to vector<1x4xf32>
    %71 = vector.shape_cast %70 : vector<1x4xf32> to vector<4xf32>
    %72 = vector.shape_cast %71 : vector<4xf32> to vector<1x1x4xf32>
    %73 = vector.extract_strided_slice %22 {offsets = [7, 0], sizes = [1, 4], strides = [1, 1]} : vector<9x4xf32> to vector<1x4xf32>
    %74 = vector.shape_cast %73 : vector<1x4xf32> to vector<4xf32>
    %75 = vector.shape_cast %74 : vector<4xf32> to vector<1x1x4xf32>
    %76 = vector.extract_strided_slice %22 {offsets = [8, 0], sizes = [1, 4], strides = [1, 1]} : vector<9x4xf32> to vector<1x4xf32>
    %77 = vector.shape_cast %76 : vector<1x4xf32> to vector<4xf32>
    %78 = vector.shape_cast %77 : vector<4xf32> to vector<1x1x4xf32>
    %79 = vector.extract_strided_slice %19 {offsets = [2, 0, 0], sizes = [8, 16, 4], strides = [1, 1, 1]} : vector<10x16x4xf32> to vector<8x16x4xf32>
    %80 = vector.broadcast %72 : vector<1x1x4xf32> to vector<8x16x4xf32>
    %81 = arith.mulf %79, %80 : vector<8x16x4xf32>
    %82 = arith.addf %69, %81 : vector<8x16x4xf32>
    %83 = vector.extract_strided_slice %16 {offsets = [2, 0, 0], sizes = [8, 16, 4], strides = [1, 1, 1]} : vector<10x16x4xf32> to vector<8x16x4xf32>
    %84 = vector.broadcast %75 : vector<1x1x4xf32> to vector<8x16x4xf32>
    %85 = arith.mulf %83, %84 : vector<8x16x4xf32>
    %86 = arith.addf %82, %85 : vector<8x16x4xf32>
    %87 = vector.extract_strided_slice %21 {offsets = [2, 0, 0], sizes = [8, 16, 4], strides = [1, 1, 1]} : vector<10x16x4xf32> to vector<8x16x4xf32>
    %88 = vector.broadcast %78 : vector<1x1x4xf32> to vector<8x16x4xf32>
    %89 = arith.mulf %87, %88 : vector<8x16x4xf32>
    %90 = arith.addf %86, %89 : vector<8x16x4xf32>
    %c0_20 = arith.constant 0 : index
    %c0_21 = arith.constant 0 : index
    %91 = vector.load %arg8[%c0_20, %c0_21] : memref<1x8xf32, #tpu.memory_space<vmem>>, vector<1x8xf32>
    %92 = vector.shape_cast %91 : vector<1x8xf32> to vector<1x1x8xf32>
    %c0_22 = arith.constant 0 : index
    %c0_23 = arith.constant 0 : index
    %93 = vector.load %arg7[%c0_22, %c0_23] : memref<4x8xf32, #tpu.memory_space<vmem>>, vector<4x8xf32>
    %cst_24 = arith.constant 0.000000e+00 : f32
    %94 = vector.broadcast %cst_24 : f32 to vector<8x16x8xf32>
    %95 = vector.broadcast %92 : vector<1x1x8xf32> to vector<8x16x8xf32>
    %96 = arith.addf %94, %95 : vector<8x16x8xf32>
    %97 = vector.extract_strided_slice %90 {offsets = [0, 0, 0], sizes = [8, 16, 1], strides = [1, 1, 1]} : vector<8x16x4xf32> to vector<8x16x1xf32>
    %98 = vector.extract_strided_slice %93 {offsets = [0, 0], sizes = [1, 8], strides = [1, 1]} : vector<4x8xf32> to vector<1x8xf32>
    %99 = vector.shape_cast %98 : vector<1x8xf32> to vector<8xf32>
    %100 = vector.shape_cast %99 : vector<8xf32> to vector<1x1x8xf32>
    %101 = vector.broadcast %97 : vector<8x16x1xf32> to vector<8x16x8xf32>
    %102 = vector.broadcast %100 : vector<1x1x8xf32> to vector<8x16x8xf32>
    %103 = arith.mulf %101, %102 : vector<8x16x8xf32>
    %104 = arith.addf %96, %103 : vector<8x16x8xf32>
    %105 = vector.extract_strided_slice %90 {offsets = [0, 0, 1], sizes = [8, 16, 1], strides = [1, 1, 1]} : vector<8x16x4xf32> to vector<8x16x1xf32>
    %106 = vector.extract_strided_slice %93 {offsets = [1, 0], sizes = [1, 8], strides = [1, 1]} : vector<4x8xf32> to vector<1x8xf32>
    %107 = vector.shape_cast %106 : vector<1x8xf32> to vector<8xf32>
    %108 = vector.shape_cast %107 : vector<8xf32> to vector<1x1x8xf32>
    %109 = vector.broadcast %105 : vector<8x16x1xf32> to vector<8x16x8xf32>
    %110 = vector.broadcast %108 : vector<1x1x8xf32> to vector<8x16x8xf32>
    %111 = arith.mulf %109, %110 : vector<8x16x8xf32>
    %112 = arith.addf %104, %111 : vector<8x16x8xf32>
    %113 = vector.extract_strided_slice %90 {offsets = [0, 0, 2], sizes = [8, 16, 1], strides = [1, 1, 1]} : vector<8x16x4xf32> to vector<8x16x1xf32>
    %114 = vector.extract_strided_slice %93 {offsets = [2, 0], sizes = [1, 8], strides = [1, 1]} : vector<4x8xf32> to vector<1x8xf32>
    %115 = vector.shape_cast %114 : vector<1x8xf32> to vector<8xf32>
    %116 = vector.shape_cast %115 : vector<8xf32> to vector<1x1x8xf32>
    %117 = vector.broadcast %113 : vector<8x16x1xf32> to vector<8x16x8xf32>
    %118 = vector.broadcast %116 : vector<1x1x8xf32> to vector<8x16x8xf32>
    %119 = arith.mulf %117, %118 : vector<8x16x8xf32>
    %120 = arith.addf %112, %119 : vector<8x16x8xf32>
    %121 = vector.extract_strided_slice %90 {offsets = [0, 0, 3], sizes = [8, 16, 1], strides = [1, 1, 1]} : vector<8x16x4xf32> to vector<8x16x1xf32>
    %122 = vector.extract_strided_slice %93 {offsets = [3, 0], sizes = [1, 8], strides = [1, 1]} : vector<4x8xf32> to vector<1x8xf32>
    %123 = vector.shape_cast %122 : vector<1x8xf32> to vector<8xf32>
    %124 = vector.shape_cast %123 : vector<8xf32> to vector<1x1x8xf32>
    %125 = vector.broadcast %121 : vector<8x16x1xf32> to vector<8x16x8xf32>
    %126 = vector.broadcast %124 : vector<1x1x8xf32> to vector<8x16x8xf32>
    %127 = arith.mulf %125, %126 : vector<8x16x8xf32>
    %128 = arith.addf %120, %127 : vector<8x16x8xf32>
    %c0_25 = arith.constant 0 : index
    %c0_26 = arith.constant 0 : index
    %c0_27 = arith.constant 0 : index
    %c0_28 = arith.constant 0 : index
    %129 = vector.load %arg9[%c0_25, %c0_26, %c0_27, %c0_28] : memref<1x8x16x8xf32, #tpu.memory_space<vmem>>, vector<1x8x16x8xf32>
    %130 = vector.shape_cast %129 : vector<1x8x16x8xf32> to vector<8x16x8xf32>
    %131 = vector.shape_cast %128 : vector<8x16x8xf32> to vector<1x8x16x8xf32>
    tpu.vector_store %arg9[%c0_25, %c0_26, %c0_27, %c0_28], %131 {strides = array<i32>} : memref<1x8x16x8xf32, #tpu.memory_space<vmem>>, vector<1x8x16x8xf32>,
    return
  }
  func.func @transform_0(%arg0: i32, %arg1: i32) -> (i32, i32, i32, i32) {
    %c8_i32 = arith.constant 8 : i32
    %0 = arith.muli %arg1, %c8_i32 : i32
    %c1_i32 = arith.constant 1 : i32
    %1 = arith.subi %0, %c1_i32 : i32
    %c0_i32 = arith.constant 0 : i32
    %2 = arith.maxsi %1, %c0_i32 : i32
    %c0_i32_0 = arith.constant 0 : i32
    %c0_i32_1 = arith.constant 0 : i32
    %c0_i32_2 = arith.constant 0 : i32
    return %arg0, %2, %c0_i32_0, %c0_i32_1 : i32, i32, i32, i32
  }
  func.func @transform_1(%arg0: i32, %arg1: i32) -> (i32, i32, i32, i32) {
    %c0_i32 = arith.constant 0 : i32
    %c0_i32_0 = arith.constant 0 : i32
    %c0_i32_1 = arith.constant 0 : i32
    return %arg0, %arg1, %c0_i32, %c0_i32_0 : i32, i32, i32, i32
  }
  func.func @transform_2(%arg0: i32, %arg1: i32) -> (i32, i32, i32, i32) {
    %c1_i32 = arith.constant 1 : i32
    %0 = arith.addi %arg1, %c1_i32 : i32
    %c8_i32 = arith.constant 8 : i32
    %1 = arith.muli %0, %c8_i32 : i32
    %c15_i32 = arith.constant 15 : i32
    %2 = arith.minsi %1, %c15_i32 : i32
    %c0_i32 = arith.constant 0 : i32
    %c0_i32_0 = arith.constant 0 : i32
    %c0_i32_1 = arith.constant 0 : i32
    return %arg0, %2, %c0_i32, %c0_i32_0 : i32, i32, i32, i32
  }
  func.func @transform_3(%arg0: i32, %arg1: i32) -> (i32, i32) {
    %c0_i32 = arith.constant 0 : i32
    %c0_i32_0 = arith.constant 0 : i32
    %c0_i32_1 = arith.constant 0 : i32
    return %c0_i32, %c0_i32_0 : i32, i32
  }
  func.func @transform_4(%arg0: i32, %arg1: i32) -> (i32, i32) {
    %c0_i32 = arith.constant 0 : i32
    %c0_i32_0 = arith.constant 0 : i32
    %c0_i32_1 = arith.constant 0 : i32
    return %c0_i32, %c0_i32_0 : i32, i32
  }
  func.func @transform_5(%arg0: i32, %arg1: i32) -> (i32, i32) {
    %c0_i32 = arith.constant 0 : i32
    %c0_i32_0 = arith.constant 0 : i32
    %c0_i32_1 = arith.constant 0 : i32
    return %c0_i32, %c0_i32_0 : i32, i32
  }
  func.func @transform_6(%arg0: i32, %arg1: i32) -> (i32, i32) {
    %c0_i32 = arith.constant 0 : i32
    %c0_i32_0 = arith.constant 0 : i32
    %c0_i32_1 = arith.constant 0 : i32
    return %c0_i32, %c0_i32_0 : i32, i32
  }
  func.func @transform_7(%arg0: i32, %arg1: i32) -> (i32, i32, i32, i32) {
    %c0_i32 = arith.constant 0 : i32
    %c0_i32_0 = arith.constant 0 : i32
    %c0_i32_1 = arith.constant 0 : i32
    return %arg0, %arg1, %c0_i32, %c0_i32_0 : i32, i32, i32, i32
  }
}

</mosaic_0001>

<bundles_post_ra>
// kernel: tpu_custom_call.1
= control target key start
LH: loop header
LB: loop body
LE: loop exit
PB: predicated region body
PF: predicated region fallthrough
CT: control target
= control target key end

     0   :  { %s1721_s24 = smov 0   ;;  %s1723_s25 = smov 0   ;;  %s2663_s0 = inlined_call_operand.vmem [shape: f32[2,16,16,4], index: 0, kind: input, shape index: {}]   ;;  %s2664_s1 = inlined_call_operand.vmem [shape: f32[2,16,16,4], index: 1, kind: input, shape index: {}]   ;;  %s2665_s2 = inlined_call_operand.vmem [shape: f32[2,16,16,4], index: 2, kind: input, shape index: {}]   ;;  %s2666_s3 = inlined_call_operand.vmem [shape: f32[9,4], index: 3, kind: input, shape index: {}]   ;;  %s2667_s4 = inlined_call_operand.vmem [shape: f32[1,4], index: 4, kind: input, shape index: {}]   ;;  %s2668_s5 = inlined_call_operand.vmem [shape: f32[4,8], index: 5, kind: input, shape index: {}]   ;;  %s2669_s6 = inlined_call_operand.vmem [shape: f32[1,8], index: 6, kind: input, shape index: {}]   ;;  %s2670_s7 = inlined_call_operand.vmem [shape: f32[2,16,16,8], index: 7, kind: output, shape index: {}]  }
   0x1   :  { %s1725_s26 = smov 0   ;;  %s1727_s27 = smov 0  }
   0x2   :  { %s1729_s28 = smov 0  }
   0x3 LB: > { %s26_s29 = sadd.s32 1, %s1667_s26  ;;  %s29_s30 = sadd.s32 1, %s1671_s27  ;;  %s1675_s28 = sphi %s1729_s28, %s17_s28   ;;  %s1671_s27 = sphi %s1727_s27, %s2711_s27   ;;  %s1667_s26 = sphi %s1725_s26, %s2710_s26   ;;  %s1663_s25 = sphi %s1723_s25, %s2709_s25   ;;  %s1659_s24 = sphi %s1721_s24, %s2708_s24  }
   0x4   : > { %p27_p0 = scmp.ge.s32.totalorder %s26_s29, 2  ;;  %p1546_p1 = scmp.ge.s32.totalorder %s1675_s28, 1 }
   0x5   : > { %p323_p2 = scmp.lt.s32.totalorder %s1675_s28, 5 }
   0x6   : > { %s2713_s29 = smov (%p27_p0, %s26_s29), 0  ;;  %s2715_s30 = smov (!%p27_p0, %s29_s30), %s1671_s27 }
   0x7   : > { %p324_p3 = pnand %p1546_p1, %p323_p2  ;;  %p31_p4 = scmp.ge.s32.totalorder %s2715_s30, 2 }
   0x9   : > { %s2717_s30 = smov (%p31_p4, %s2715_s30), 0  ;;  %327 = sbr.rel (%p324_p3) target bundleno = 355 (0x163), region = 48 }
   0xe   : > { %s1754_s8 = sshll.u32 %s1659_s24, 3  ;;  %p395_p5 = scmp.lt.s32.totalorder %s1663_s25, 1  ;;  %v629_v0 = vlaneseq  ;;  %v1677_v1 = vmov 0   ;;  %v619_v5 = vld [vmem:[%s2666_s3] sm:$0xff]  ;;  %vm497_vm0 = vcmask 1040384   ;;  %vm558_vm1 = vcmask 1046528  }
   0xf   : > { %1630 = vset.pattern.permute.xlu0 %v1677_v1  ;;  %1629 = vset.pattern.permute.xlu1 %v1677_v1  ;;  %p411_p6 = scmp.lt.s32.totalorder %s1754_s8, 15  ;;  %v1834_v32 = vld [vmem:[%s2667_s4] ss:$0 sm:$0xff]  ;;  %s1847_s21 = sadd.s32 4294967295, %s1754_s8  ;;  %v1890_v55 = vld [vmem:[%s2666_s3 + $0x8] ss:$0 sm:$0xff] }
  0x10   : > { %s2719_s25 = smov (!%p395_p5, %s1663_s25), 1  ;;  %v1757_v2 = vshrl.u32 %v629_v0, 7  ;;  %p393_p7 = scmp.gt.s32.totalorder %s1847_s21, 0  ;;  %vm1378_vm2 = vcmask 64512  }
  0x11   : > { %s412_s9 = scalar_select %p411_p6, %s1754_s8, 15 }
  0x12   : > { %2689 = vst [vmem:[#allocation2_spill] sm:$0xff] %v1757_v2  ;;  %s1760_s10 = sshll.u32 %s2719_s25, 5  ;;  %v2674_v3 = vsub.s32 0, %v1757_v2  ;;  %v2673_v4 = vsub.s32 1, %v1757_v2  ;;  %v2672_v6 = vsub.s32 2, %v1757_v2  ;;  %v2671_v7 = vsub.s32 3, %v1757_v2 }
  0x13   : > { %s1558_s11 = sshll.u32 %s412_s9, 1  ;;  %v775_v8 = vsub.s32 4, %v1757_v2  ;;  %v811_v9 = vsub.s32 5, %v1757_v2  ;;  %v847_v12 = vsub.s32 6, %v1757_v2  ;;  %v883_v13 = vsub.s32 7, %v1757_v2  ;;  %p1549_p8 = scmp.lt.s32.totalorder %s1847_s21, 15 }
  0x14   : > { %s1772_s14 = sadd.s32 %s1558_s11, %s1760_s10  ;;  %v1776_v10 = vrot.slane %v619_v5, %v2673_v4  ;;  %v1788_v11 = vrot.slane %v619_v5, %v2674_v3  ;;  %v1803_v17 = vrot.slane %v619_v5, %v2672_v6  ;;  %v1807_v18 = vrot.slane %v619_v5, %v2671_v7  ;;  %s1584_s12 = sadd.s32 8, %s1754_s8 }
  0x15   : > { %s1560_s15 = sshll.u32 %s1772_s14, 3  ;;  %v1809_v19 = vrot.slane %v619_v5, %v775_v8  ;;  %v1811_v20 = vrot.slane %v619_v5, %v811_v9  ;;  %v1868_v44 = vrot.slane %v619_v5, %v847_v12  ;;  %v1874_v48 = vrot.slane %v619_v5, %v883_v13  ;;  %p2085_p9 = scmp.lt.s32.totalorder %s1584_s12, 15 }
  0x16   : > { %s1784_s18 = scalar_lea.vmem %s2664_s1, %s1560_s15  ;;  %p449_p10 = scmp.eq.s32.totalorder %s1659_s24, 1 }
  0x17   : > { %v1793_v14 = vld [vmem:[%s1784_s18 + $0x10] sm:$0xff]  ;;  %v1796_v15 = vld [vmem:[%s1784_s18 + $0x18] sm:$0xff]  ;;  %v1799_v16 = vld [vmem:[%s1784_s18 + $0x20] sm:$0xff]  ;;  %s394_s25 = scalar_select %p393_p7, %s1847_s21, 0 }
  0x18   : > { %v1814_v21 = vld [vmem:[%s1784_s18 + $0x28] sm:$0xff]  ;;  %v1817_v22 = vld [vmem:[%s1784_s18 + $0x30] sm:$0xff]  ;;  %v1820_v23 = vld [vmem:[%s1784_s18 + $0x38] sm:$0xff]  ;;  %v504_v24 = vrot.slane %v1793_v14, 7  ;;  %v507_v25 = vrot.slane %v1799_v16, 7  ;;  %v565_v26 = vrot.slane %v1793_v14, 1  ;;  %v673_v27 = vmul.f32 %v1776_v10, %v1793_v14 }
  0x19   : > { %v2676_v28 = vrot.slane %v1817_v22, 7  ;;  %v566_v29 = vrot.slane %v1796_v15, 1  ;;  %v568_v30 = vrot.slane %v1799_v16, 1  ;;  %v569_v31 = vrot.slane %v1814_v21, 1  ;;  %v1877_v49 = vld [vmem:[%s1784_s18] sm:$0xff]  ;;  %v1885_v54 = vld [vmem:[%s1784_s18 + $0x8] sm:$0xff] }
  0x1a   : > { %v1839_v33 = vsel %vm497_vm0, 0.0, %v504_v24  ;;  %v551_v34 = vsel %vm497_vm0, 0.0, %v507_v25  ;;  %v571_v35 = vrot.slane %v1817_v22, 1  ;;  %v2675_v36 = vrot.slane %v1820_v23, 1  ;;  %s2721_s25 = smov (!%p1549_p8, %s394_s25), 15  ;;  %s2723_s12 = smov (!%p2085_p9, %s1584_s12), 15 }
  0x1b   : > { %v552_v37 = vsel %vm497_vm0, 0.0, %v2676_v28  ;;  %v1855_v38 = vsel %vm558_vm1, %v565_v26, %v566_v29  ;;  %v570_v39 = vsel %vm558_vm1, %v568_v30, %v569_v31  ;;  %v637_v40 = vmul.f32 %v1788_v11, %v1839_v33  ;;  %s1554_s9 = sshll.u32 %s2721_s25, 1  ;;  %s2725_s12 = smov (!%p2085_p9, %s2723_s12), 15 }
  0x1c   : > { %v573_v41 = vsel %vm558_vm1, %v571_v35, %v2675_v36  ;;  %v641_v42 = vmul.f32 %v1788_v11, %v552_v37  ;;  %v677_v43 = vmul.f32 %v1776_v10, %v1817_v22  ;;  %v639_v45 = vmul.f32 %v1788_v11, %v551_v34  ;;  %s1949_s11 = sadd.s32 %s1760_s10, %s1554_s9  ;;  %s1565_s8 = sshll.u32 %s2725_s12, 1 }
  0x1d   : > { %v653_v46 = vadd.f32 %v1834_v32, %v637_v40  ;;  %v709_v47 = vmul.f32 %v1803_v17, %v1855_v38  ;;  %v711_v51 = vmul.f32 %v1803_v17, %v570_v39  ;;  %v713_v52 = vmul.f32 %v1803_v17, %v573_v41  ;;  %s429_s16 = sadd.s32 %s1565_s8, %s1760_s10  ;;  %s1556_s21 = sshll.u32 %s1949_s11, 3 }
  0x1e   : > { %v657_v50 = vadd.f32 %v1834_v32, %v641_v42  ;;  %v745_v53 = vmul.f32 %v1807_v18, %v551_v34  ;;  %v747_v57 = vmul.f32 %v1807_v18, %v552_v37  ;;  %v781_v58 = vmul.f32 %v1809_v19, %v1799_v16  ;;  %s1567_s10 = sshll.u32 %s429_s16, 3  ;;  %p447_p11 = scmp.eq.s32.totalorder %s1659_s24, 0 }
  0x1f   : > { %v689_v56 = vadd.f32 %v673_v27, %v653_v46  ;;  %v817_v59 = vmul.f32 %v1811_v20, %v570_v39  ;;  %v1898_v61 = vmul.f32 %v1811_v20, %v573_v41  ;;  %v853_v62 = vmul.f32 %v1868_v44, %v552_v37  ;;  %v1918_v27 = vld [vmem:[%s1784_s18 + $0x40] sm:$0xff]  ;;  %s431_s19 = scalar_lea.vmem %s2665_s2, %s1567_s10  ;;  %s403_s25 = scalar_lea.vmem %s2663_s0, %s1556_s21 }
  0x20   : > { %v693_v60 = vadd.f32 %v677_v43, %v657_v50  ;;  %v501_v63 = vrot.slane %v1877_v49, 7  ;;  %v889_v1 = vmul.f32 %v1874_v48, %v1817_v22  ;;  %v562_v5 = vrot.slane %v1877_v49, 1  ;;  %s450_s20 = scalar_select %p449_p10, 0.0, 1.0 }
  0x21   : > { %v725_v0 = vadd.f32 %v709_v47, %v689_v56  ;;  %v563_v8 = vrot.slane %v1885_v54, 1  ;;  %v925_v12 = vmul.f32 %v1890_v55, %v573_v41  ;;  %v671_v26 = vmul.f32 %v1776_v10, %v1877_v49  ;;  %v1928_v41 = vld [vmem:[%s1784_s18 + $0x48] sm:$0xff]  ;;  %s448_s9 = scalar_select %p447_p11, 0.0, 1.0 }
  0x22   : > { %v1909_v9 = vadd.f32 %v713_v52, %v693_v60  ;;  %v1913_v13 = vsel %vm497_vm0, 0.0, %v501_v63  ;;  %v743_v40 = vmul.f32 %v1807_v18, %v1839_v33  ;;  %v779_v43 = vmul.f32 %v1809_v19, %v1793_v14  ;;  %s2544_s10 = scalar_lea.vmem %s2670_s7, %s1560_s15 }
  0x23   : > { %v761_v30 = vadd.f32 %v745_v53, %v725_v0  ;;  %v1921_v35 = vsel %vm558_vm1, %v562_v5, %v563_v8  ;;  %v635_v37 = vmul.f32 %v1788_v11, %v1913_v13  ;;  %v815_v46 = vmul.f32 %v1811_v20, %v1855_v38 }
  0x24   : > { %v707_v42 = vmul.f32 %v1803_v17, %v1921_v35  ;;  %v851_v47 = vmul.f32 %v1868_v44, %v551_v34  ;;  %v2677_v53 = vrot.slane %v1918_v27, 7  ;;  %v574_v56 = vrot.slane %v1918_v27, 1 }
  0x25   : > { %v797_v50 = vadd.f32 %v781_v58, %v761_v30  ;;  %v651_v52 = vadd.f32 %v1834_v32, %v635_v37  ;;  %v887_v60 = vmul.f32 %v1874_v48, %v1799_v16  ;;  %v2678_v0 = vrot.slane %v1928_v41, 1 }
  0x26   : > { %v655_v5 = vadd.f32 %v1834_v32, %v639_v45  ;;  %v675_v7 = vmul.f32 %v1776_v10, %v1799_v16  ;;  %v923_v30 = vmul.f32 %v1890_v55, %v570_v39  ;;  %v553_v37 = vsel %vm497_vm0, 0.0, %v2677_v53 }
  0x27   : > { %v833_v34 = vadd.f32 %v817_v59, %v797_v50  ;;  %v687_v58 = vadd.f32 %v671_v26, %v651_v52  ;;  %v576_v6 = vsel %vm558_vm1, %v574_v56, %v2678_v0  ;;  %v643_v4 = vmul.f32 %v1788_v11, %v553_v37 }
  0x28   : > { %v679_v45 = vmul.f32 %v1776_v10, %v1918_v27  ;;  %v691_v3 = vadd.f32 %v675_v7, %v655_v5  ;;  %v1962_v59 = vmul.f32 %v1807_v18, %v553_v37  ;;  %v783_v39 = vmul.f32 %v1809_v19, %v1817_v22 }
  0x29   : > { %v869_v36 = vadd.f32 %v853_v62, %v833_v34  ;;  %v723_v28 = vadd.f32 %v707_v42, %v687_v58  ;;  %v659_v26 = vadd.f32 %v1834_v32, %v643_v4  ;;  %v715_v50 = vmul.f32 %v1803_v17, %v576_v6 }
  0x2a   : > { %v727_v52 = vadd.f32 %v711_v51, %v691_v3  ;;  %v1969_v56 = vmul.f32 %v1811_v20, %v576_v6  ;;  %v855_v7 = vmul.f32 %v1868_v44, %v553_v37  ;;  %v502_v62 = vrot.slane %v1885_v54, 7 }
  0x2b   : > { %v905_v53 = vadd.f32 %v889_v1, %v869_v36  ;;  %v759_v0 = vadd.f32 %v743_v40, %v723_v28  ;;  %v891_v5 = vmul.f32 %v1874_v48, %v1918_v27  ;;  %v505_v34 = vrot.slane %v1796_v15, 7 }
  0x2c   : > { %v763_v42 = vadd.f32 %v747_v57, %v727_v52  ;;  %v508_v4 = vrot.slane %v1814_v21, 7  ;;  %v927_v51 = vmul.f32 %v1890_v55, %v576_v6  ;;  %v1981_v36 = vsel %vm497_vm0, %v501_v63, %v502_v62 }
  0x2d   : > { %v1977_v58 = vadd.f32 %v925_v12, %v905_v53  ;;  %v795_v3 = vadd.f32 %v779_v43, %v759_v0  ;;  %v695_v28 = vadd.f32 %v679_v45, %v659_v26  ;;  %v1987_v40 = vsel %vm558_vm1, %v563_v8, 0.0 }
  0x2e   : > { %v799_v1 = vadd.f32 %v783_v39, %v763_v42  ;;  %v509_v57 = vsel %vm497_vm0, %v507_v25, %v508_v4  ;;  %v1993_v12 = vsel %vm497_vm0, %v504_v24, %v505_v34  ;;  %v612_v6 = vsel %vm558_vm1, %v569_v31, 0.0  ;;  %v2031_v4 = vld [vmem:[%s1784_s18 + $0x58] sm:$0xff] }
  0x2f   : > { %984 = vperm.xlu0 %1630, %v1977_v58   ;;  %v831_v37 = vadd.f32 %v815_v46, %v795_v3  ;;  %v636_v16 = vmul.f32 %v1788_v11, %v1981_v36  ;;  %v2004_v63 = vsel %vm558_vm1, %v566_v29, 0.0  ;;  %v640_v8 = vmul.f32 %v1788_v11, %v509_v57 }
  0x30   : > { %v835_v25 = vadd.f32 %v1898_v61, %v799_v1  ;;  %v672_v24 = vmul.f32 %v1776_v10, %v1885_v54  ;;  %v676_v31 = vmul.f32 %v1776_v10, %v1814_v21  ;;  %v708_v61 = vmul.f32 %v1803_v17, %v1987_v40 }
  0x31   : > { %v867_v43 = vadd.f32 %v851_v47, %v831_v37  ;;  %v652_v46 = vadd.f32 %v1834_v32, %v636_v16  ;;  %v2014_v53 = vadd.f32 %v715_v50, %v695_v28  ;;  %v656_v0 = vadd.f32 %v1834_v32, %v640_v8 }
  0x32   : > { %v871_v29 = vadd.f32 %v855_v7, %v835_v25  ;;  %v712_v45 = vmul.f32 %v1803_v17, %v612_v6  ;;  %v638_v47 = vmul.f32 %v1788_v11, %v1993_v12  ;;  %v744_v52 = vmul.f32 %v1807_v18, %v1993_v12  ;;  %v2028_v7 = vld [vmem:[%s1784_s18 + $0x50] sm:$0xff] }
  0x33   : > { %v903_v39 = vadd.f32 %v887_v60, %v867_v43  ;;  %v688_v26 = vadd.f32 %v672_v24, %v652_v46  ;;  %v692_v42 = vadd.f32 %v676_v31, %v656_v0  ;;  %v710_v34 = vmul.f32 %v1803_v17, %v2004_v63 }
  0x34   : > { %v907_v62 = vadd.f32 %v891_v5, %v871_v29  ;;  %v2025_v50 = vmul.f32 %v1807_v18, %v509_v57  ;;  %v780_v28 = vmul.f32 %v1809_v19, %v1796_v15  ;;  %v816_v5 = vmul.f32 %v1811_v20, %v2004_v63 }
  0x35   : > { %v2033_v60 = vadd.f32 %v923_v30, %v903_v39  ;;  %v724_v3 = vadd.f32 %v708_v61, %v688_v26  ;;  %v2041_v37 = vadd.f32 %v712_v45, %v692_v42  ;;  %v2044_v16 = vmul.f32 %v1811_v20, %v612_v6 }
  0x36   : > { %v2039_v1 = vadd.f32 %v927_v51, %v907_v62  ;;  %v852_v25 = vmul.f32 %v1868_v44, %v509_v57  ;;  %v2679_v8 = vrot.slane %v2028_v7, 7  ;;  %v577_v24 = vrot.slane %v2028_v7, 1 }
  0x37   : > { %974 = vperm.xlu1 %1629, %v2033_v60   ;;  %v760_v30 = vadd.f32 %v744_v52, %v724_v3  ;;  %v2680_v43 = vrot.slane %v2031_v4, 1  ;;  %v888_v51 = vmul.f32 %v1874_v48, %v1814_v21  ;;  %v924_v46 = vmul.f32 %v1890_v55, %v612_v6 }
  0x38   : > { %994 = vperm.xlu0 %1630, %v2039_v1   ;;  %v765_v31 = vadd.f32 %v1962_v59, %v1909_v9  ;;  %v785_v57 = vmul.f32 %v1809_v19, %v1918_v27  ;;  %v554_v29 = vsel %vm497_vm0, 0.0, %v2679_v8  ;;  %v511_v45 = vrot.slane %v1820_v23, 7  ;;  %v2099_v8 = vld [vmem:[%s1784_s18 + $0x60] sm:$0xff] }
  0x39   : > { %v796_v61 = vadd.f32 %v780_v28, %v760_v30  ;;  %v579_v0 = vsel %vm558_vm1, %v577_v24, %v2680_v43  ;;  %v645_v6 = vmul.f32 %v1788_v11, %v554_v29  ;;  %v681_v9 = vmul.f32 %v1776_v10, %v2028_v7 }
  0x3a   : > { %v801_v59 = vadd.f32 %v785_v57, %v765_v31  ;;  %v893_v39 = vmul.f32 %v1874_v48, %v2028_v7  ;;  %v717_v52 = vmul.f32 %v1803_v17, %v579_v0  ;;  %v751_v62 = vmul.f32 %v1807_v18, %v554_v29 }
  0x3b   : > { %v832_v26 = vadd.f32 %v816_v5, %v796_v61  ;;  %v857_v42 = vmul.f32 %v1868_v44, %v554_v29  ;;  %v661_v3 = vadd.f32 %v1834_v32, %v645_v6  ;;  %v2690_v30 = vrot.slane %v1817_v22, 7 }
  0x3c   : > { %v837_v28 = vadd.f32 %v1969_v56, %v801_v59  ;;  %v2691_v31 = vrot.slane %v1820_v23, 1  ;;  %v654_v56 = vadd.f32 %v1834_v32, %v638_v47  ;;  %v674_v22 = vmul.f32 %v1776_v10, %v1796_v15 }
  0x3d   : > { %v512_v24 = vsel %vm497_vm0, %v2690_v30, %v511_v45  ;;  %v868_v5 = vadd.f32 %v852_v25, %v832_v26  ;;  %v697_v29 = vadd.f32 %v681_v9, %v661_v3  ;;  %v929_v6 = vmul.f32 %v1890_v55, %v579_v0 }
  0x3e   : > { %v613_v57 = vsel %vm558_vm1, %v2691_v31, 0.0  ;;  %v642_v61 = vmul.f32 %v1788_v11, %v512_v24  ;;  %v873_v45 = vadd.f32 %v857_v42, %v837_v28  ;;  %v678_v59 = vmul.f32 %v1776_v10, %v1820_v23  ;;  %v2106_v42 = vld [vmem:[%s1784_s18 + $0x68] sm:$0xff] }
  0x3f   : > { %v904_v30 = vadd.f32 %v888_v51, %v868_v5  ;;  %v823_v25 = vmul.f32 %v1811_v20, %v579_v0  ;;  %v690_v31 = vadd.f32 %v674_v22, %v654_v56  ;;  %v2101_v47 = vadd.f32 %v717_v52, %v697_v29 }
  0x40   : > { %v658_v26 = vadd.f32 %v1834_v32, %v642_v61  ;;  %v909_v43 = vadd.f32 %v893_v39, %v873_v45  ;;  %v714_v2 = vmul.f32 %v1803_v17, %v613_v57  ;;  %v748_v9 = vmul.f32 %v1807_v18, %v512_v24 }
  0x41   : > { %v2114_v51 = vadd.f32 %v924_v46, %v904_v30  ;;  %v726_v3 = vadd.f32 %v710_v34, %v690_v31  ;;  %v782_v52 = vmul.f32 %v1809_v19, %v1814_v21  ;;  %v820_v28 = vmul.f32 %v1811_v20, %v613_v57 }
  0x42   : > { %v694_v0 = vadd.f32 %v678_v59, %v658_v26  ;;  %v2118_v39 = vadd.f32 %v929_v6, %v909_v43  ;;  %v854_v5 = vmul.f32 %v1868_v44, %v512_v24  ;;  %v2684_v61 = vrot.slane %v2099_v8, 7 }
  0x43   : > { %979 = vperm.xlu1 %1629, %v2114_v51   ;;  %v762_v46 = vadd.f32 %v2025_v50, %v726_v3  ;;  %v890_v34 = vmul.f32 %v1874_v48, %v1820_v23  ;;  %v580_v56 = vrot.slane %v2099_v8, 1  ;;  %v2683_v22 = vrot.slane %v2106_v42, 1 }
  0x44   : > { %2693 = vst [vmem:[#allocation3_spill] sm:$0xff] %v2118_v39  ;;  %1004 = vperm.xlu0 %1630, %v2118_v39   ;;  %v926_v21 = vmul.f32 %v1890_v55, %v613_v57  ;;  %v555_v43 = vsel %vm497_vm0, 0.0, %v2684_v61  ;;  %v767_v24 = vadd.f32 %v751_v62, %v2014_v53  ;;  %v787_v50 = vmul.f32 %v1809_v19, %v2028_v7 }
  0x45   : > { %v2140_v29 = vadd.f32 %v714_v2, %v694_v0  ;;  %v798_v45 = vadd.f32 %v782_v52, %v762_v46  ;;  %v582_v6 = vsel %vm558_vm1, %v580_v56, %v2683_v22  ;;  %v647_v57 = vmul.f32 %v1788_v11, %v555_v43 }
  0x46   : > { %v683_v59 = vmul.f32 %v1776_v10, %v2099_v8  ;;  %v753_v30 = vmul.f32 %v1807_v18, %v555_v43  ;;  %v803_v53 = vadd.f32 %v787_v50, %v767_v24  ;;  %v859_v62 = vmul.f32 %v1868_v44, %v555_v43 }
  0x47   : > { %v834_v26 = vadd.f32 %v2044_v16, %v798_v45  ;;  %v663_v2 = vadd.f32 %v1834_v32, %v647_v57  ;;  %v719_v31 = vmul.f32 %v1803_v17, %v582_v6  ;;  %v825_v0 = vmul.f32 %v1811_v20, %v582_v6 }
  0x48   : > { %v839_v3 = vadd.f32 %v823_v25, %v803_v53  ;;  %v895_v52 = vmul.f32 %v1874_v48, %v2099_v8  ;;  %v514_v46 = vrot.slane %v1928_v41, 7  ;;  %v2694_v56 = vrot.slane %v1928_v41, 1 }
  0x49   : > { %v870_v16 = vadd.f32 %v854_v5, %v834_v26  ;;  %v931_v24 = vmul.f32 %v1890_v55, %v582_v6  ;;  %v680_v50 = vmul.f32 %v1776_v10, %v1928_v41  ;;  %v764_v25 = vadd.f32 %v748_v9, %v2041_v37  ;;  %v2176_v37 = vld [vmem:[%s1784_s18 + $0x78] sm:$0xff] }
  0x4a   : > { %v614_v43 = vsel %vm558_vm1, %v2694_v56, 0.0  ;;  %v699_v45 = vadd.f32 %v683_v59, %v663_v2  ;;  %v875_v57 = vadd.f32 %v859_v62, %v839_v3  ;;  %v2695_v53 = vrot.slane %v1918_v27, 7  ;;  %v2170_v56 = vld [vmem:[%s1784_s18 + $0x70] sm:$0xff] }
  0x4b   : > { %v784_v61 = vmul.f32 %v1809_v19, %v1820_v23  ;;  %v906_v39 = vadd.f32 %v890_v34, %v870_v16  ;;  %v716_v6 = vmul.f32 %v1803_v17, %v614_v43  ;;  %v822_v26 = vmul.f32 %v1811_v20, %v614_v43 }
  0x4c   : > { %v515_v22 = vsel %vm497_vm0, %v2695_v53, %v514_v46  ;;  %v911_v9 = vadd.f32 %v895_v52, %v875_v57  ;;  %v892_v2 = vmul.f32 %v1874_v48, %v1928_v41  ;;  %v2688_v3 = vrot.slane %v2170_v56, 7 }
  0x4d   : > { %v644_v5 = vmul.f32 %v1788_v11, %v515_v22  ;;  %v750_v27 = vmul.f32 %v1807_v18, %v515_v22  ;;  %v800_v59 = vadd.f32 %v784_v61, %v764_v25  ;;  %v856_v62 = vmul.f32 %v1868_v44, %v515_v22 }
  0x4e   : > { %v2181_v23 = vadd.f32 %v926_v21, %v906_v39  ;;  %v2187_v46 = vadd.f32 %v931_v24, %v911_v9  ;;  %v583_v53 = vrot.slane %v2170_v56, 1  ;;  %v2687_v52 = vrot.slane %v2176_v37, 1 }
  0x4f   : > { %v660_v34 = vadd.f32 %v1834_v32, %v644_v5  ;;  %v836_v16 = vadd.f32 %v820_v28, %v800_v59  ;;  %v556_v61 = vsel %vm497_vm0, 0.0, %v2688_v3  ;;  %v769_v22 = vadd.f32 %v753_v30, %v2101_v47 }
  0x50   : > { %989 = vperm.xlu1 %1629, %v2181_v23   ;;  %v789_v21 = vmul.f32 %v1809_v19, %v2099_v8  ;;  %v735_v28 = vadd.f32 %v719_v31, %v699_v45  ;;  %1014 = vperm.xlu0 %1630, %v2187_v46   ;;  %v928_v25 = vmul.f32 %v1890_v55, %v614_v43  ;;  %v517_v43 = vrot.slane %v2031_v4, 7 }
  0x51   : > { %v696_v39 = vadd.f32 %v680_v50, %v660_v34  ;;  %v872_v24 = vadd.f32 %v856_v62, %v836_v16  ;;  %v585_v50 = vsel %vm558_vm1, %v583_v53, %v2687_v52  ;;  %v755_v5 = vmul.f32 %v1807_v18, %v556_v61 }
  0x52   : > { %v805_v9 = vadd.f32 %v789_v21, %v769_v22  ;;  %v861_v47 = vmul.f32 %v1868_v44, %v556_v61  ;;  %v827_v31 = vmul.f32 %v1811_v20, %v585_v50  ;;  %v2696_v45 = vrot.slane %v2031_v4, 1  ;;  %v473_v21 = vld [vmem:[%s431_s19 + $0x8] sm:$0xff] }
  0x53   : > { %v2204_v57 = vadd.f32 %v716_v6, %v696_v39  ;;  %v908_v30 = vadd.f32 %v892_v2, %v872_v24  ;;  %v897_v62 = vmul.f32 %v1874_v48, %v2170_v56  ;;  %v933_v34 = vmul.f32 %v1890_v55, %v585_v50 }
  0x54   : > { %v615_v59 = vsel %vm558_vm1, %v2696_v45, 0.0  ;;  %v841_v6 = vadd.f32 %v825_v0, %v805_v9  ;;  %v766_v16 = vadd.f32 %v750_v27, %v2140_v29  ;;  %v2697_v2 = vrot.slane %v2028_v7, 7  ;;  %v472_v0 = vld [vmem:[%s431_s19] sm:$0xff] }
  0x55   : > { %v2222_v53 = vadd.f32 %v928_v25, %v908_v30  ;;  %v682_v61 = vmul.f32 %v1776_v10, %v2031_v4  ;;  %v786_v22 = vmul.f32 %v1809_v19, %v1928_v41  ;;  %v718_v50 = vmul.f32 %v1803_v17, %v615_v59 }
  0x56   : > { %v518_v39 = vsel %vm497_vm0, %v2697_v2, %v517_v43  ;;  %v877_v24 = vadd.f32 %v861_v47, %v841_v6  ;;  %v894_v25 = vmul.f32 %v1874_v48, %v2031_v4  ;;  %v474_v30 = vstv %s450_s20 }
  0x57   : > { %v646_v9 = vmul.f32 %v1788_v11, %v518_v39  ;;  %v752_v29 = vmul.f32 %v1807_v18, %v518_v39  ;;  %999 = vperm.xlu1 %1629, %v2222_v53   ;;  %v802_v7 = vadd.f32 %v786_v22, %v766_v16  ;;  %v858_v27 = vmul.f32 %v1868_v44, %v518_v39 }
  0x58   : > { %v913_v43 = vadd.f32 %v897_v62, %v877_v24  ;;  %v2239_v45 = vmul.f32 %v474_v30, %v472_v0  ;;  %v2241_v47 = vmul.f32 %v474_v30, %v473_v21  ;;  %v771_v2 = vadd.f32 %v755_v5, %v735_v28 }
  0x59   : > { %v662_v41 = vadd.f32 %v1834_v32, %v646_v9  ;;  %v838_v6 = vadd.f32 %v822_v26, %v802_v7  ;;  %v791_v52 = vmul.f32 %v1809_v19, %v2170_v56  ;;  %v520_v16 = vrot.slane %v2106_v42, 7 }
  0x5a   : > { %v2246_v22 = vadd.f32 %v933_v34, %v913_v43  ;;  %v525_v3 = vrot.slane %v2239_v45, 7  ;;  %v586_v62 = vrot.slane %v2239_v45, 1  ;;  %v930_v21 = vmul.f32 %v1890_v55, %v615_v59 }
  0x5b   : > { %v698_v39 = vadd.f32 %v682_v61, %v662_v41  ;;  %v874_v0 = vadd.f32 %v858_v27, %v838_v6  ;;  %v587_v26 = vrot.slane %v2241_v47, 1  ;;  %v807_v28 = vadd.f32 %v791_v52, %v771_v2 }
  0x5c   : > { %1024 = vperm.xlu0 %1630, %v2246_v22   ;;  %v557_v34 = vsel %vm497_vm0, 0.0, %v525_v3  ;;  %v899_v61 = vmul.f32 %v1874_v48, %v2239_v45  ;;  %v2698_v24 = vrot.slane %v2099_v8, 7  ;;  %v2699_v43 = vrot.slane %v2106_v42, 1 }
  0x5d   : > { %v734_v5 = vadd.f32 %v718_v50, %v698_v39  ;;  %v910_v7 = vadd.f32 %v894_v25, %v874_v0  ;;  %v588_v27 = vsel %vm558_vm1, %v586_v62, %v587_v26  ;;  %v843_v52 = vadd.f32 %v827_v31, %v807_v28 }
  0x5e   : > { %v521_v9 = vsel %vm497_vm0, %v2698_v24, %v520_v16  ;;  %v863_v30 = vmul.f32 %v1868_v44, %v557_v34  ;;  %v935_v50 = vmul.f32 %v1890_v55, %v588_v27  ;;  %v616_v41 = vsel %vm558_vm1, %v2699_v43, 0.0 }
  0x5f   : > { %v648_v8 = vmul.f32 %v1788_v11, %v521_v9  ;;  %v684_v25 = vmul.f32 %v1776_v10, %v2106_v42  ;;  %v2274_v6 = vadd.f32 %v930_v21, %v910_v7  ;;  %v754_v31 = vmul.f32 %v1807_v18, %v521_v9 }
  0x60   : > { %v879_v2 = vadd.f32 %v863_v30, %v843_v52  ;;  %v768_v16 = vadd.f32 %v752_v29, %v2204_v57  ;;  %v824_v39 = vmul.f32 %v1811_v20, %v615_v59  ;;  %v788_v0 = vmul.f32 %v1809_v19, %v2031_v4  ;;  %v467_v52 = vld [vmem:[%s403_s25] sm:$0xff] }
  0x61   : > { %v664_v62 = vadd.f32 %v1834_v32, %v648_v8  ;;  %1009 = vperm.xlu1 %1629, %v2274_v6   ;;  %v523_v28 = vrot.slane %v2176_v37, 7  ;;  %v720_v57 = vmul.f32 %v1803_v17, %v616_v41  ;;  %v860_v59 = vmul.f32 %v1868_v44, %v521_v9 }
  0x62   : > { %v915_v21 = vadd.f32 %v899_v61, %v879_v2  ;;  %v804_v29 = vadd.f32 %v788_v0, %v768_v16  ;;  %v770_v34 = vadd.f32 %v754_v31, %v734_v5  ;;  %v826_v7 = vmul.f32 %v1811_v20, %v616_v41  ;;  %v468_v61 = vld [vmem:[%s403_s25 + $0x8] sm:$0xff] }
  0x63   : > { %v700_v4 = vadd.f32 %v684_v25, %v664_v62  ;;  %v790_v27 = vmul.f32 %v1809_v19, %v2106_v42  ;;  %v896_v43 = vmul.f32 %v1874_v48, %v2106_v42  ;;  %v2700_v8 = vrot.slane %v2170_v56, 7 }
  0x64   : > { %v2291_v24 = vadd.f32 %v935_v50, %v915_v21  ;;  %v840_v30 = vadd.f32 %v824_v39, %v804_v29  ;;  %v932_v5 = vmul.f32 %v1890_v55, %v616_v41  ;;  %v469_v25 = vstv %s448_s9 }
  0x65   : > { %v524_v2 = vsel %vm497_vm0, %v2700_v8, %v523_v28  ;;  %v806_v9 = vadd.f32 %v790_v27, %v770_v34  ;;  %v2701_v16 = vrot.slane %v2176_v37, 1  ;;  %v470_v62 = vmul.f32 %v469_v25, %v467_v52 }
  0x66   : > { %1034 = vperm.xlu0 %1630, %v2291_v24   ;;  %v862_v50 = vmul.f32 %v1868_v44, %v524_v2  ;;  %v876_v31 = vadd.f32 %v860_v59, %v840_v30  ;;  %v471_v0 = vmul.f32 %v469_v25, %v468_v61  ;;  %v736_v42 = vadd.f32 %v720_v57, %v700_v4 }
  0x67   : > { %v617_v39 = vsel %vm558_vm1, %v2701_v16, 0.0  ;;  %v756_v56 = vmul.f32 %v1807_v18, %v524_v2  ;;  %v842_v21 = vadd.f32 %v826_v7, %v806_v9  ;;  %v898_v28 = vmul.f32 %v1874_v48, %v2176_v37 }
  0x68   : > { %v912_v29 = vadd.f32 %v896_v43, %v876_v31  ;;  %v498_v41 = vrot.slane %v470_v62, 7  ;;  %v559_v34 = vrot.slane %v470_v62, 1  ;;  %v560_v27 = vrot.slane %v471_v0, 1 }
  0x69   : > { %v878_v8 = vadd.f32 %v862_v50, %v842_v21  ;;  %v934_v59 = vmul.f32 %v1890_v55, %v617_v39  ;;  %v526_v57 = vrot.slane %v2241_v47, 7  ;;  %v669_v61 = vmul.f32 %v1776_v10, %v470_v62 }
  0x6a   : > { %v2311_v30 = vadd.f32 %v932_v5, %v912_v29  ;;  %v548_v16 = vsel %vm497_vm0, 0.0, %v498_v41  ;;  %v561_v52 = vsel %vm558_vm1, %v559_v34, %v560_v27  ;;  %v828_v43 = vmul.f32 %v1811_v20, %v617_v39 }
  0x6b   : > { %v914_v4 = vadd.f32 %v898_v28, %v878_v8  ;;  %v633_v7 = vmul.f32 %v1788_v11, %v548_v16  ;;  %v527_v2 = vsel %vm497_vm0, %v525_v3, %v526_v57  ;;  %v772_v5 = vadd.f32 %v756_v56, %v736_v42 }
  0x6c   : > { %1019 = vperm.xlu1 %1629, %v2311_v30   ;;  %v792_v9 = vmul.f32 %v1809_v19, %v2176_v37  ;;  %v705_v31 = vmul.f32 %v1803_v17, %v561_v52  ;;  %v864_v62 = vmul.f32 %v1868_v44, %v527_v2  ;;  %v499_v28 = vrot.slane %v471_v0, 7 }
  0x6d   : > { %v2325_v50 = vadd.f32 %v934_v59, %v914_v4  ;;  %v649_v25 = vadd.f32 %v1834_v32, %v633_v7  ;;  %v741_v45 = vmul.f32 %v1807_v18, %v1913_v13  ;;  %v618_v3 = vsel %vm558_vm1, %v587_v26, 0.0 }
  0x6e   : > { %v808_v21 = vadd.f32 %v792_v9, %v772_v5  ;;  %v900_v39 = vmul.f32 %v1874_v48, %v2241_v47  ;;  %v500_v42 = vsel %vm497_vm0, %v498_v41, %v499_v28  ;;  %v609_v56 = vsel %vm558_vm1, %v560_v27, 0.0 }
  0x6f   : > { %v685_v29 = vadd.f32 %v669_v61, %v649_v25  ;;  %v777_v8 = vmul.f32 %v1809_v19, %v1877_v49  ;;  %v634_v13 = vmul.f32 %v1788_v11, %v500_v42  ;;  %v670_v59 = vmul.f32 %v1776_v10, %v471_v0 }
  0x70   : > { %1029 = vperm.xlu1 %1629, %v2325_v50   ;;  %v844_v37 = vadd.f32 %v828_v43, %v808_v21  ;;  %v936_v26 = vmul.f32 %v1890_v55, %v618_v3  ;;  %v813_v57 = vmul.f32 %v1811_v20, %v1921_v35  ;;  %v706_v41 = vmul.f32 %v1803_v17, %v609_v56  ;;  %v2445_v3 = vld [vmem:[%s2669_s6] ss:$0 sm:$0xff] }
  0x71   : > { %v721_v34 = vadd.f32 %v705_v31, %v685_v29  ;;  %v650_v47 = vadd.f32 %v1834_v32, %v634_v13  ;;  %v849_v49 = vmul.f32 %v1868_v44, %v1839_v33  ;;  %v742_v10 = vmul.f32 %v1807_v18, %v1981_v36 }
  0x72   : > { %v880_v16 = vadd.f32 %v864_v62, %v844_v37  ;;  %v885_v61 = vmul.f32 %v1874_v48, %v1793_v14  ;;  %v778_v32 = vmul.f32 %v1809_v19, %v1885_v54  ;;  %v921_v33 = vmul.f32 %v1890_v55, %v1855_v38 }
  0x73   : > { %v757_v52 = vadd.f32 %v741_v45, %v721_v34  ;;  %v686_v7 = vadd.f32 %v670_v59, %v650_v47  ;;  %v814_v18 = vmul.f32 %v1811_v20, %v1987_v40  ;;  %v850_v5 = vmul.f32 %v1868_v44, %v1993_v12 }
  0x74   : > { %v916_v27 = vadd.f32 %v900_v39, %v880_v16  ;;  %v1678_v14 = vmov 1   ;;  %v886_v19 = vmul.f32 %v1874_v48, %v1796_v15  ;;  %v922_v54 = vmul.f32 %v1890_v55, %v2004_v63  ;;  %v2702_v15 = vld [vmem:[#allocation3_spill] sm:$0xff] }
  0x75   : > { %v793_v4 = vadd.f32 %v777_v8, %v757_v52  ;;  %v722_v35 = vadd.f32 %v706_v41, %v686_v7  ;;  %v1679_v44 = vmov 2   ;;  %v1680_v48 = vmov 3  }
  0x76   : > { %v2353_v11 = vadd.f32 %v936_v26, %v916_v27 }
  0x77   : > { %v829_v0 = vadd.f32 %v813_v57, %v793_v4  ;;  %v758_v43 = vadd.f32 %v742_v10, %v722_v35 }
  0x78   : > { %1039 = vperm.xlu1 %1629, %v2353_v11  }
  0x79   : > { %v865_v17 = vadd.f32 %v849_v49, %v829_v0  ;;  %v794_v2 = vadd.f32 %v778_v32, %v758_v43 }
  0x7b   : > { %v901_v36 = vadd.f32 %v885_v61, %v865_v17  ;;  %v830_v25 = vadd.f32 %v814_v18, %v794_v2 }
  0x7c   : > { %1631 = vset.pattern.permute.xlu1 %v1678_v14 }
  0x7d   : > { %v937_v9 = vadd.f32 %v921_v33, %v901_v36  ;;  %1087 = vperm.xlu1 %1631, %v2033_v60   ;;  %v866_v38 = vadd.f32 %v850_v5, %v830_v25 }
  0x7f   : > { %964 = vperm.xlu0 %1630, %v937_v9   ;;  %v902_v20 = vadd.f32 %v886_v19, %v866_v38 }
  0x81   : > { %v938_v40 = vadd.f32 %v922_v54, %v902_v20 }
  0x83   : > { %969 = vperm.xlu0 %1630, %v938_v40   ;;  %1083 = vperm.xlu1 %1631, %v938_v40  }
  0x87   : > { %1632 = vset.pattern.permute.xlu0 %v1678_v14  ;;  %1095 = vperm.xlu1 %1631, %v1977_v58  }
  0x88   : > { %1079 = vperm.xlu0 %1632, %v937_v9  }
  0x8b   : > { %1103 = vperm.xlu1 %1631, %v2039_v1  }
  0x8c   : > { %1091 = vperm.xlu0 %1632, %v2114_v51  }
  0x8f   : > { %1111 = vperm.xlu1 %1631, %v2702_v15  }
  0x90   : > { %1099 = vperm.xlu0 %1632, %v2181_v23  }
  0x93   : > { %1119 = vperm.xlu1 %1631, %v2187_v46  }
  0x94   : > { %1107 = vperm.xlu0 %1632, %v2222_v53  }
  0x97   : > { %1127 = vperm.xlu1 %1631, %v2246_v22  }
  0x98   : > { %1115 = vperm.xlu0 %1632, %v2274_v6  }
  0x9b   : > { %1135 = vperm.xlu1 %1631, %v2291_v24  }
  0x9c   : > { %1123 = vperm.xlu0 %1632, %v2311_v30  }
  0x9f   : > { %1633 = vset.pattern.permute.xlu1 %v1679_v44 }
  0xa0   : > { %1131 = vperm.xlu0 %1632, %v2325_v50   ;;  %1179 = vperm.xlu1 %1633, %v937_v9  }
  0xa4   : > { %1139 = vperm.xlu0 %1632, %v2353_v11   ;;  %1187 = vperm.xlu1 %1633, %v2033_v60  }
  0xa8   : > { %1634 = vset.pattern.permute.xlu0 %v1679_v44  ;;  %1191 = vperm.xlu1 %1633, %v2114_v51  }
  0xa9   : > { %1183 = vperm.xlu0 %1634, %v938_v40  }
  0xaa   : > { %v985_v31 = vpop.permute.xlu0 %984 }
  0xac   : > { %1199 = vperm.xlu1 %1633, %v2181_v23  }
  0xad   : > { %1195 = vperm.xlu0 %1634, %v1977_v58  }
  0xb0   : > { %1207 = vperm.xlu1 %1633, %v2222_v53  }
  0xb1   : > { %1203 = vperm.xlu0 %1634, %v2039_v1  }
  0xb2   : > { %v975_v55 = vpop.permute.xlu1 %974 }
  0xb4   : > { %1215 = vperm.xlu1 %1633, %v2274_v6  }
  0xb5   : > { %1211 = vperm.xlu0 %1634, %v2702_v15  }
  0xb8   : > { %1223 = vperm.xlu1 %1633, %v2311_v30  }
  0xb9   : > { %1219 = vperm.xlu0 %1634, %v2187_v46  }
  0xbc   : > { %1231 = vperm.xlu1 %1633, %v2325_v50  }
  0xbd   : > { %1227 = vperm.xlu0 %1634, %v2246_v22  }
  0xbe   : > { %v2401_v12 = vpop.permute.xlu1 %979 }
  0xc0   : > { %1239 = vperm.xlu1 %1633, %v2353_v11  }
  0xc1   : > { %1235 = vperm.xlu0 %1634, %v2291_v24  }
  0xc4   : > { %1636 = vset.pattern.permute.xlu1 %v1680_v48 }
  0xc5   : > { %1635 = vset.pattern.permute.xlu0 %v1680_v48  ;;  %1283 = vperm.xlu1 %1636, %v938_v40  }
  0xc6   : > { %1279 = vperm.xlu0 %1635, %v937_v9  }
  0xc9   : > { %1287 = vperm.xlu1 %1636, %v2033_v60  }
  0xca   : > { %1291 = vperm.xlu0 %1635, %v2114_v51  }
  0xcb   : > { %v2406_v63 = vpop.permute.xlu1 %989 }
  0xcd   : > { %1295 = vperm.xlu1 %1636, %v1977_v58   ;;  %v995_v58 = vpop.permute.xlu0 %994 }
  0xce   : > { %1299 = vperm.xlu0 %1635, %v2181_v23  }
  0xd1   : > { %1303 = vperm.xlu1 %1636, %v2039_v1   ;;  %v1005_v51 = vpop.permute.xlu0 %1004 }
  0xd2   : > { %1307 = vperm.xlu0 %1635, %v2222_v53   ;;  %v2411_v60 = vpop.permute.xlu1 %999 }
  0xd5   : > { %1311 = vperm.xlu1 %1636, %v2702_v15   ;;  %v1015_v53 = vpop.permute.xlu0 %1014 }
  0xd6   : > { %1315 = vperm.xlu0 %1635, %v2274_v6   ;;  %v2427_v6 = vld [vmem:[%s2668_s5] sm:$0xf] }
  0xd9   : > { %1319 = vperm.xlu1 %1636, %v2187_v46  }
  0xda   : > { %1323 = vperm.xlu0 %1635, %v2311_v30   ;;  %v2703_v30 = vld [vmem:[#allocation2_spill] sm:$0xff] }
  0xdb   : > { %v2705_v29 = vsub.s32 1, %v2703_v30 }
  0xdc   : > { %v2416_v1 = vpop.permute.xlu1 %1009 }
  0xdd   : > { %1327 = vperm.xlu1 %1636, %v2246_v22   ;;  %v1025_v22 = vpop.permute.xlu0 %1024  ;;  %v2440_v45 = vrot.slane %v2427_v6, %v2705_v29 }
  0xde   : > { %1331 = vperm.xlu0 %1635, %v2325_v50   ;;  %v2704_v50 = vsub.s32 0, %v2703_v30 }
  0xe0   : > { %v2432_v21 = vrot.slane %v2427_v6, %v2704_v50 }
  0xe1   : > { %1335 = vperm.xlu1 %1636, %v2291_v24   ;;  %v1035_v24 = vpop.permute.xlu0 %1034 }
  0xe2   : > { %1339 = vperm.xlu0 %1635, %v2353_v11   ;;  %v1048_v28 = vmul.f32 %v2432_v21, %v975_v55  ;;  %v1050_v59 = vmul.f32 %v2432_v21, %v985_v31  ;;  %v1052_v52 = vmul.f32 %v2432_v21, %v995_v58  ;;  %v1054_v49 = vmul.f32 %v2432_v21, %v1005_v51 }
  0xe3   : > { %v1056_v35 = vmul.f32 %v2432_v21, %v1015_v53  ;;  %v1058_v36 = vmul.f32 %v2432_v21, %v1025_v22  ;;  %v1060_v19 = vmul.f32 %v2432_v21, %v1035_v24 }
  0xe4   : > { %v1064_v39 = vadd.f32 %v2445_v3, %v1048_v28  ;;  %v1066_v26 = vadd.f32 %v2445_v3, %v1050_v59  ;;  %v1068_v4 = vadd.f32 %v2445_v3, %v1052_v52  ;;  %v1070_v61 = vadd.f32 %v2445_v3, %v1054_v49 }
  0xe5   : > { %v1072_v18 = vadd.f32 %v2445_v3, %v1056_v35  ;;  %v1074_v25 = vadd.f32 %v2445_v3, %v1058_v36  ;;  %v1076_v15 = vadd.f32 %v2445_v3, %v1060_v19  ;;  %v1051_v19 = vmul.f32 %v2432_v21, %v2406_v63 }
  0xe7   : > { %v2420_v23 = vpop.permute.xlu1 %1019 }
  0xeb   : > { %v2422_v46 = vpop.permute.xlu1 %1029 }
  0xf3   : > { %v2434_v62 = vpop.permute.xlu1 %1039 }
  0xf8   : > { %v1088_v37 = vpop.permute.xlu1 %1087 }
  0xf9   : > { %v1148_v42 = vmul.f32 %v2440_v45, %v1088_v37 }
  0xfa   : > { %v965_v56 = vpop.permute.xlu0 %964 }
  0xfb   : > { %v2449_v34 = vadd.f32 %v1148_v42, %v1064_v39  ;;  %v1046_v49 = vmul.f32 %v2432_v21, %v965_v56 }
  0xfe   : > { %v970_v8 = vpop.permute.xlu0 %969  ;;  %v1084_v13 = vpop.permute.xlu1 %1083 }
 0x102   : > { %v1096_v16 = vpop.permute.xlu1 %1095 }
 0x103   : > { %v1080_v57 = vpop.permute.xlu0 %1079  ;;  %v1150_v47 = vmul.f32 %v2440_v45, %v1096_v16 }
 0x105   : > { %v2455_v41 = vadd.f32 %v1150_v47, %v1066_v26  ;;  %v1047_v47 = vmul.f32 %v2432_v21, %v970_v8  ;;  %v1049_v8 = vmul.f32 %v2432_v21, %v2401_v12 }
 0x106   : > { %v1104_v27 = vpop.permute.xlu1 %1103 }
 0x107   : > { %v1092_v7 = vpop.permute.xlu0 %1091  ;;  %v1152_v10 = vmul.f32 %v2440_v45, %v1104_v27  ;;  %v2706_v27 = vsub.s32 2, %v2703_v30 }
 0x109   : > { %v2460_v11 = vadd.f32 %v1152_v10, %v1068_v4  ;;  %v2511_v4 = vrot.slane %v2427_v6, %v2706_v27  ;;  %v1147_v10 = vmul.f32 %v2440_v45, %v1084_v13  ;;  %v2707_v13 = vsub.s32 3, %v2703_v30 }
 0x10a   : > { %v1112_v0 = vpop.permute.xlu1 %1111 }
 0x10b   : > { %v2464_v32 = vpop.permute.xlu0 %1099  ;;  %v1154_v17 = vmul.f32 %v2440_v45, %v1112_v0  ;;  %v2529_v36 = vrot.slane %v2427_v6, %v2707_v13 }
 0x10d   : > { %v2467_v33 = vadd.f32 %v1154_v17, %v1070_v61  ;;  %v1146_v61 = vmul.f32 %v2440_v45, %v1080_v57  ;;  %v1063_v17 = vadd.f32 %v2445_v3, %v1047_v47 }
 0x10e   : > { %v1120_v43 = vpop.permute.xlu1 %1119 }
 0x10f   : > { %v2471_v2 = vpop.permute.xlu0 %1107  ;;  %v1156_v5 = vmul.f32 %v2440_v45, %v1120_v43  ;;  %v1163_v57 = vadd.f32 %v1147_v10, %v1063_v17  ;;  %v1053_v17 = vmul.f32 %v2432_v21, %v2411_v60 }
 0x111   : > { %v2474_v14 = vadd.f32 %v1156_v5, %v1072_v18  ;;  %v1062_v18 = vadd.f32 %v2445_v3, %v1046_v49 }
 0x112   : > { %v1128_v9 = vpop.permute.xlu1 %1127 }
 0x113   : > { %v2478_v38 = vpop.permute.xlu0 %1115  ;;  %v1158_v54 = vmul.f32 %v2440_v45, %v1128_v9  ;;  %v1162_v5 = vadd.f32 %v1146_v61, %v1062_v18  ;;  %v1149_v9 = vmul.f32 %v2440_v45, %v1092_v7 }
 0x115   : > { %v2481_v20 = vadd.f32 %v1158_v54, %v1074_v25 }
 0x116   : > { %v1136_v40 = vpop.permute.xlu1 %1135 }
 0x117   : > { %v2484_v44 = vpop.permute.xlu0 %1123  ;;  %v1160_v48 = vmul.f32 %v2440_v45, %v1136_v40 }
 0x119   : > { %v2487_v55 = vadd.f32 %v1160_v48, %v1076_v15  ;;  %v1065_v48 = vadd.f32 %v2445_v3, %v1049_v8 }
 0x11b   : > { %v2489_v31 = vpop.permute.xlu0 %1131  ;;  %v1180_v58 = vpop.permute.xlu1 %1179  ;;  %v1165_v7 = vadd.f32 %v1149_v9, %v1065_v48 }
 0x11c   : > { %v1246_v56 = vmul.f32 %v2511_v4, %v1180_v58 }
 0x11e   : > { %v1262_v30 = vadd.f32 %v1246_v56, %v1162_v5 }
 0x11f   : > { %v2491_v51 = vpop.permute.xlu0 %1139  ;;  %v1188_v53 = vpop.permute.xlu1 %1187 }
 0x120   : > { %v1248_v12 = vmul.f32 %v2511_v4, %v1188_v53  ;;  %v1151_v53 = vmul.f32 %v2440_v45, %v2464_v32 }
 0x122   : > { %v1264_v27 = vadd.f32 %v1248_v12, %v2449_v34 }
 0x123   : > { %v1192_v22 = vpop.permute.xlu1 %1191 }
 0x124   : > { %v1184_v50 = vpop.permute.xlu0 %1183  ;;  %v1249_v6 = vmul.f32 %v2511_v4, %v1192_v22  ;;  %v1067_v22 = vadd.f32 %v2445_v3, %v1051_v19 }
 0x125   : > { %v1247_v43 = vmul.f32 %v2511_v4, %v1184_v50 }
 0x126   : > { %v1167_v18 = vadd.f32 %v1151_v53, %v1067_v22  ;;  %v1157_v53 = vmul.f32 %v2440_v45, %v2484_v44  ;;  %v1059_v22 = vmul.f32 %v2432_v21, %v2422_v46 }
 0x127   : > { %v1200_v24 = vpop.permute.xlu1 %1199  ;;  %v1263_v54 = vadd.f32 %v1247_v43, %v1163_v57  ;;  %v1265_v43 = vadd.f32 %v1249_v6, %v1165_v7  ;;  %v1055_v57 = vmul.f32 %v2432_v21, %v2416_v1 }
 0x128   : > { %v1196_v28 = vpop.permute.xlu0 %1195  ;;  %v1251_v32 = vmul.f32 %v2511_v4, %v1200_v24 }
 0x129   : > { %v1250_v49 = vmul.f32 %v2511_v4, %v1196_v28  ;;  %v1153_v28 = vmul.f32 %v2440_v45, %v2471_v2 }
 0x12a   : > { %v1267_v19 = vadd.f32 %v1251_v32, %v1167_v18 }
 0x12b   : > { %v2493_v29 = vpop.permute.xlu1 %1207  ;;  %v1266_v60 = vadd.f32 %v1250_v49, %v2455_v41 }
 0x12c   : > { %v1204_v37 = vpop.permute.xlu0 %1203  ;;  %v1253_v2 = vmul.f32 %v2511_v4, %v2493_v29 }
 0x12d   : > { %v1252_v5 = vmul.f32 %v2511_v4, %v1204_v37  ;;  %v1155_v37 = vmul.f32 %v2440_v45, %v2478_v38 }
 0x12f   : > { %v2495_v39 = vpop.permute.xlu1 %1215  ;;  %v1268_v48 = vadd.f32 %v1252_v5, %v2460_v11 }
 0x130   : > { %v2497_v42 = vpop.permute.xlu0 %1211  ;;  %v1255_v38 = vmul.f32 %v2511_v4, %v2495_v39 }
 0x133   : > { %v2499_v59 = vpop.permute.xlu1 %1223 }
 0x134   : > { %v2501_v16 = vpop.permute.xlu0 %1219  ;;  %v1257_v44 = vmul.f32 %v2511_v4, %v2499_v59 }
 0x135   : > { %v1256_v39 = vmul.f32 %v2511_v4, %v2501_v16  ;;  %v1159_v16 = vmul.f32 %v2440_v45, %v2489_v31 }
 0x137   : > { %v2503_v26 = vpop.permute.xlu1 %1231 }
 0x138   : > { %v2505_v52 = vpop.permute.xlu0 %1227  ;;  %v1259_v31 = vmul.f32 %v2511_v4, %v2503_v26 }
 0x139   : > { %v1258_v18 = vmul.f32 %v2511_v4, %v2505_v52 }
 0x13b   : > { %v2515_v0 = vpop.permute.xlu1 %1239 }
 0x13c   : > { %v2518_v35 = vpop.permute.xlu0 %1235 }
 0x140   : > { %v1284_v25 = vpop.permute.xlu1 %1283 }
 0x141   : > { %v1280_v40 = vpop.permute.xlu0 %1279  ;;  %v1347_v15 = vmul.f32 %v2529_v36, %v1284_v25  ;;  %v1069_v25 = vadd.f32 %v2445_v3, %v1053_v17 }
 0x142   : > { %v1346_v58 = vmul.f32 %v2529_v36, %v1280_v40 }
 0x143   : > { %v1363_v63 = vadd.f32 %v1347_v15, %v1263_v54  ;;  %v1169_v54 = vadd.f32 %v1153_v28, %v1069_v25  ;;  %v1071_v15 = vadd.f32 %v2445_v3, %v1055_v57 }
 0x144   : > { %v1362_v50 = vadd.f32 %v1346_v58, %v1262_v30  ;;  %v1288_v47 = vpop.permute.xlu1 %1287  ;;  %v1254_v30 = vmul.f32 %v2511_v4, %v2497_v42  ;;  %v1057_v58 = vmul.f32 %v2432_v21, %v2420_v23 }
 0x145   : > { %v1292_v10 = vpop.permute.xlu0 %1291  ;;  %1380 = vst.msk [vmem:[%s2544_s10 + $0x8] sm:$0xff] %vm1378_vm2, %v1363_v63  ;;  %v1348_v61 = vmul.f32 %v2529_v36, %v1288_v47  ;;  %v1269_v63 = vadd.f32 %v1253_v2, %v1169_v54  ;;  %v1171_v42 = vadd.f32 %v1155_v37, %v1071_v15 }
 0x146   : > { %1379 = vst.msk [vmem:[%s2544_s10] sm:$0xff] %vm1378_vm2, %v1362_v50  ;;  %v1349_v8 = vmul.f32 %v2529_v36, %v1292_v10  ;;  %v1270_v23 = vadd.f32 %v1254_v30, %v2467_v33  ;;  %v1073_v10 = vadd.f32 %v2445_v3, %v1057_v58 }
 0x147   : > { %v1364_v34 = vadd.f32 %v1348_v61, %v1264_v27  ;;  %v1271_v61 = vadd.f32 %v1255_v38, %v1171_v42 }
 0x148   : > { %v1365_v56 = vadd.f32 %v1349_v8, %v1265_v43  ;;  %v1296_v13 = vpop.permute.xlu1 %1295  ;;  %v1173_v17 = vadd.f32 %v1157_v53, %v1073_v10  ;;  %v1075_v8 = vadd.f32 %v2445_v3, %v1059_v22 }
 0x149   : > { %v1300_v24 = vpop.permute.xlu0 %1299  ;;  %1381 = vst.msk [vmem:[%s2544_s10 + $0x10] sm:$0xff] %vm1378_vm2, %v1364_v34  ;;  %v1350_v9 = vmul.f32 %v2529_v36, %v1296_v13  ;;  %v1272_v34 = vadd.f32 %v1256_v39, %v2474_v14 }
 0x14a   : > { %1382 = vst.msk [vmem:[%s2544_s10 + $0x18] sm:$0xff] %vm1378_vm2, %v1365_v56  ;;  %v1351_v1 = vmul.f32 %v2529_v36, %v1300_v24  ;;  %v1061_v56 = vmul.f32 %v2432_v21, %v2434_v62  ;;  %v1273_v13 = vadd.f32 %v1257_v44, %v1173_v17  ;;  %v1175_v52 = vadd.f32 %v1159_v16, %v1075_v8 }
 0x14b   : > { %v1366_v41 = vadd.f32 %v1350_v9, %v1266_v60  ;;  %v1161_v60 = vmul.f32 %v2440_v45, %v2491_v51  ;;  %v1274_v9 = vadd.f32 %v1258_v18, %v2481_v20  ;;  %v1260_v21 = vmul.f32 %v2511_v4, %v2518_v35 }
 0x14c   : > { %v1367_v12 = vadd.f32 %v1351_v1, %v1267_v19  ;;  %v1304_v40 = vpop.permute.xlu1 %1303  ;;  %v1077_v25 = vadd.f32 %v2445_v3, %v1061_v56  ;;  %v1275_v19 = vadd.f32 %v1259_v31, %v1175_v52  ;;  %v1261_v45 = vmul.f32 %v2511_v4, %v2515_v0 }
 0x14d   : > { %v1308_v29 = vpop.permute.xlu0 %1307  ;;  %1383 = vst.msk [vmem:[%s2544_s10 + $0x20] sm:$0xff] %vm1378_vm2, %v1366_v41  ;;  %v1352_v6 = vmul.f32 %v2529_v36, %v1304_v40  ;;  %v1276_v41 = vadd.f32 %v1260_v21, %v2487_v55 }
 0x14e   : > { %1384 = vst.msk [vmem:[%s2544_s10 + $0x28] sm:$0xff] %vm1378_vm2, %v1367_v12  ;;  %v1353_v11 = vmul.f32 %v2529_v36, %v1308_v29  ;;  %v1177_v35 = vadd.f32 %v1161_v60, %v1077_v25 }
 0x14f   : > { %v1368_v7 = vadd.f32 %v1352_v6, %v1268_v48 }
 0x150   : > { %v1369_v50 = vadd.f32 %v1353_v11, %v1269_v63  ;;  %v1312_v47 = vpop.permute.xlu1 %1311  ;;  %v1277_v37 = vadd.f32 %v1261_v45, %v1177_v35 }
 0x151   : > { %v1316_v27 = vpop.permute.xlu0 %1315  ;;  %1385 = vst.msk [vmem:[%s2544_s10 + $0x30] sm:$0xff] %vm1378_vm2, %v1368_v7  ;;  %v1354_v49 = vmul.f32 %v2529_v36, %v1312_v47 }
 0x152   : > { %1386 = vst.msk [vmem:[%s2544_s10 + $0x38] sm:$0xff] %vm1378_vm2, %v1369_v50  ;;  %v1355_v46 = vmul.f32 %v2529_v36, %v1316_v27 }
 0x153   : > { %v1370_v33 = vadd.f32 %v1354_v49, %v1270_v23 }
 0x154   : > { %v1371_v43 = vadd.f32 %v1355_v46, %v1271_v61  ;;  %v1320_v32 = vpop.permute.xlu1 %1319 }
 0x155   : > { %v1324_v59 = vpop.permute.xlu0 %1323  ;;  %1387 = vst.msk [vmem:[%s2544_s10 + $0x40] sm:$0xff] %vm1378_vm2, %v1370_v33  ;;  %v1356_v28 = vmul.f32 %v2529_v36, %v1320_v32 }
 0x156   : > { %1388 = vst.msk [vmem:[%s2544_s10 + $0x48] sm:$0xff] %vm1378_vm2, %v1371_v43  ;;  %v1357_v14 = vmul.f32 %v2529_v36, %v1324_v59 }
 0x157   : > { %v1372_v57 = vadd.f32 %v1356_v28, %v1272_v34 }
 0x158   : > { %v1373_v5 = vadd.f32 %v1357_v14, %v1273_v13  ;;  %v1328_v24 = vpop.permute.xlu1 %1327 }
 0x159   : > { %v1332_v62 = vpop.permute.xlu0 %1331  ;;  %1389 = vst.msk [vmem:[%s2544_s10 + $0x50] sm:$0xff] %vm1378_vm2, %v1372_v57  ;;  %v1358_v26 = vmul.f32 %v2529_v36, %v1328_v24 }
 0x15a   : > { %1390 = vst.msk [vmem:[%s2544_s10 + $0x58] sm:$0xff] %vm1378_vm2, %v1373_v5  ;;  %v1359_v20 = vmul.f32 %v2529_v36, %v1332_v62 }
 0x15b   : > { %v1374_v51 = vadd.f32 %v1358_v26, %v1274_v9 }
 0x15c   : > { %v1375_v2 = vadd.f32 %v1359_v20, %v1275_v19  ;;  %v1336_v1 = vpop.permute.xlu1 %1335 }
 0x15d   : > { %v1340_v54 = vpop.permute.xlu0 %1339  ;;  %1391 = vst.msk [vmem:[%s2544_s10 + $0x60] sm:$0xff] %vm1378_vm2, %v1374_v51  ;;  %v1360_v3 = vmul.f32 %v2529_v36, %v1336_v1 }
 0x15e   : > { %1392 = vst.msk [vmem:[%s2544_s10 + $0x68] sm:$0xff] %vm1378_vm2, %v1375_v2  ;;  %v1361_v4 = vmul.f32 %v2529_v36, %v1340_v54 }
 0x15f   : > { %v1376_v0 = vadd.f32 %v1360_v3, %v1276_v41 }
 0x160   : > { %v1377_v12 = vadd.f32 %v1361_v4, %v1277_v37 }
 0x161   : > { %1393 = vst.msk [vmem:[%s2544_s10 + $0x70] sm:$0xff] %vm1378_vm2, %v1376_v0 }
 0x162   : > { %1394 = vst.msk [vmem:[%s2544_s10 + $0x78] sm:$0xff] %vm1378_vm2, %v1377_v12 }
 0x163 PF: > { %s17_s28 = sadd.s32 1, %s1675_s28   ;;  %s2708_s24 = smov %s1667_s26 }
 0x164   : > { %p14_p12 = scmp.ge.s32.totalorder %s17_s28, 6   ;;  %s2709_s25 = smov %s1671_s27 }
 0x165   : > { %s2710_s26 = smov %s2713_s29  ;;  %s2711_s27 = smov %s2717_s30 }
 0x166   :  { %16 = sbr.rel (!%p14_p12) target bundleno = 3 (0x3), region = 84 }

</bundles_post_ra>
